<compile_context>
chip_gen: v7x
topology: tpu7x:2x2x1
jax: 0.10.0
libtpu: 0.0.40
codegen_flags: <defaults>
</compile_context>

<pallas_src>
import functools
import math

import jax
import jax.numpy as jnp
from jax.experimental import pallas as pl
from jax.experimental.pallas import tpu as pltpu

LN_EPS = 1e-5


# ----------------------------------------------------------------------------
# In-kernel helpers (trace-time Python; operate on loaded VMEM values)
# ----------------------------------------------------------------------------
def _layernorm(x, gamma, beta, eps=LN_EPS):
    mean = jnp.mean(x, axis=-1, keepdims=True)
    c = x - mean
    var = jnp.mean(c * c, axis=-1, keepdims=True)
    return c * jax.lax.rsqrt(var + eps) * gamma + beta


def _attention(q, k, v, n_heads, wo, gamma, beta, tb, s):
    """SelfAttention2 (residual='V') + LayerNorm on pre-projected Q/K/V.

    q, k, v : (tb*s, d_out) f32, already projected full-width.
              1/sqrt(d_k) is folded into the Q projection weights host-side.
    wo      : (d_out, d_out) bf16 output projection.
    """
    d_out = v.shape[-1]
    dk = d_out // n_heads
    q3 = q.reshape(tb, s, d_out)
    k3 = k.reshape(tb, s, d_out)
    v3 = v.reshape(tb, s, d_out)
    ctx = []
    for h in range(n_heads):                       # static unroll, H is small
        lo, hi = h * dk, (h + 1) * dk
        qh = q3[:, :, lo:hi]
        kh = k3[:, :, lo:hi]
        vh = v3[:, :, lo:hi]
        sc = jnp.einsum('bqd,bkd->bqk', qh, kh,
                        preferred_element_type=jnp.float32)        # (tb,s,s)
        sc = sc - jnp.max(sc, axis=-1, keepdims=True)
        p = jnp.exp(sc)
        p = p * pl.reciprocal(jnp.sum(p, axis=-1, keepdims=True), approx=True)
        ctx.append(jnp.einsum('bqk,bkd->bqd', p, vh,
                              preferred_element_type=jnp.float32))  # (tb,s,dk)
    ctx_cat = jnp.concatenate(ctx, axis=-1).reshape(tb * s, d_out)
    out = jnp.dot(ctx_cat.astype(jnp.bfloat16), wo,
                  preferred_element_type=jnp.float32) + v           # residual='V'
    return _layernorm(out, gamma, beta)


def _ffn_ln(x, w1, w2, gamma, beta):
    h = jnp.maximum(jnp.dot(x.astype(jnp.bfloat16), w1,
                            preferred_element_type=jnp.float32), 0.0)
    y = x + jnp.dot(h.astype(jnp.bfloat16), w2,
                    preferred_element_type=jnp.float32)
    return _layernorm(y, gamma, beta)


# ----------------------------------------------------------------------------
# Fused kernel: whole SemAttentionLNTransE forward for TB batch elements
# ----------------------------------------------------------------------------
def fused_kernel(x_ref, p1_ref, wo1_ref, w11_ref, w21_ref, wgo1_ref, vec1_ref,
                 p2_ref, wo2_ref, w12_ref, w22_ref, vec2_ref, o_ref,
                 *, tb, s, head1, head2):
    d_in = x_ref.shape[-1]
    x = x_ref[...].reshape(tb * s, d_in)            # (tb*s, 512), f32
    vec1 = vec1_ref[...]                            # (5, 128) f32
    vec2 = vec2_ref[...]                            # (4, 32)  f32

    # ---- layer 1: one packed lane-dense projection [Q | K | V | gate_f] ----
    proj1 = jnp.dot(x.astype(jnp.bfloat16), p1_ref[...],
                    preferred_element_type=jnp.float32)             # (tb*s, 512)
    q1, k1 = proj1[:, 0:128], proj1[:, 128:256]
    v1, gate_f = proj1[:, 256:384], proj1[:, 384:512]

    a1 = _attention(q1, k1, v1, head1, wo1_ref[...],
                    vec1[0:1], vec1[1:2], tb, s)                     # (tb*s, 128)
    out1 = _ffn_ln(a1, w11_ref[...], w21_ref[...], vec1[2:3], vec1[3:4])

    z = (jnp.dot(out1.astype(jnp.bfloat16), wgo1_ref[...],
                 preferred_element_type=jnp.float32) + gate_f + vec1[4:5])
    forget1 = out1 * jax.nn.sigmoid(z)                               # (tb*s, 128)

    # ---- layer 2: packed projection on cat(out1, forget1): [Q | K | V | 0] --
    cat = jnp.concatenate([out1, forget1], axis=-1)                  # (tb*s, 256)
    proj2 = jnp.dot(cat.astype(jnp.bfloat16), p2_ref[...],
                    preferred_element_type=jnp.float32)              # (tb*s, 128)
    q2, k2, v2 = proj2[:, 0:32], proj2[:, 32:64], proj2[:, 64:96]

    a2 = _attention(q2, k2, v2, head2, wo2_ref[...],
                    vec2[0:1], vec2[1:2], tb, s)                      # (tb*s, 32)
    out2 = _ffn_ln(a2, w12_ref[...], w22_ref[...], vec2[2:3], vec2[3:4])
    # layer2's forget gate output is never used by SemAttentionLNTransE.forward.

    o_ref[...] = out2.reshape(tb, s, out2.shape[-1])


# ----------------------------------------------------------------------------
# Host-side parameter preparation (one-time, outside the kernel)
# ----------------------------------------------------------------------------
def prepare_params(params, head1, head2):
    """Pack + bf16-cast params into the kernel argument order."""
    l1, l2 = params["layer1"], params["layer2"]
    a1, f1, g1 = l1["attn"], l1["ffn"], l1["gate"]
    a2, f2 = l2["attn"], l2["ffn"]

    d1 = a1["wq"].shape[1]                 # 128
    d2 = a2["wq"].shape[1]                 # 32
    dk1, dk2 = d1 // head1, d2 // head2
    half = a1["wq"].shape[0]               # 256

    # layer1 packed projection (512, 512): [ [wq*s;0] | [0;wk] | wv | wg_forget ]
    z1 = jnp.zeros((half, d1), jnp.float32)
    p1 = jnp.concatenate([
        jnp.concatenate([a1["wq"] / math.sqrt(dk1), z1], axis=0),   # Q from x[:, :half]
        jnp.concatenate([z1, a1["wk"]], axis=0),                    # K from x[:, half:]
        a1["wv"],                                                   # V from full x
        g1["wg_forget"],                                            # gate, forget side
    ], axis=1).astype(jnp.bfloat16)

    # layer2 packed projection (256, 128) applied to cat(out1, forget1)
    z2 = jnp.zeros((d1, d2), jnp.float32)
    p2_top = jnp.concatenate([a2["wq"] / math.sqrt(dk2), a2["wk"], z2, z2], axis=1)
    p2_bot = jnp.concatenate([z2, z2, a2["wv"], z2], axis=1)
    p2 = jnp.concatenate([p2_top, p2_bot], axis=0).astype(jnp.bfloat16)

    # packed small vectors (kept f32; used only by VPU math)
    vec1 = jnp.concatenate([a1["ln_g"], a1["ln_b"], f1["ln_g"], f1["ln_b"],
                            g1["bg"]], axis=0)                       # (5, 128)
    vec2 = jnp.concatenate([a2["ln_g"], a2["ln_b"], f2["ln_g"], f2["ln_b"]],
                           axis=0)                                   # (4, 32)

    bf = lambda w: w.astype(jnp.bfloat16)
    return [p1, bf(a1["wo"]), bf(f1["w1"]), bf(f1["w2"]), bf(g1["wg_out"]), vec1,
            p2, bf(a2["wo"]), bf(f2["w1"]), bf(f2["w2"]), vec2]


def _const_spec(shape):
    nd = len(shape)
    return pl.BlockSpec(shape, lambda b, _nd=nd: (0,) * _nd)


def _pick_tb(batch, seq, target_rows=256):
    """Batch elements per grid step: fill the MXU M dim (~256 rows) but keep
    >=2 grid steps when possible (v7x has 2 TensorCores); VMEM per step stays
    tiny (<1 MiB activations) so this also fits v7x's 64 MiB budget."""
    cap = max(1, target_rows // seq)
    divs = [d for d in range(1, batch + 1) if batch % d == 0 and d <= cap]
    tb = max(divs)
    if batch // tb < 2:
        two_step = [d for d in divs if batch // d >= 2]
        if two_step:
            tb = max(two_step)
    return tb


def sem_attention_ln_transe(x, params, head1, head2):
    batch, seq, d_in = x.shape
    flat = prepare_params(params, head1, head2)
    d_out = params["layer2"]["attn"]["wv"].shape[1]      # 32
    tb = _pick_tb(batch, seq)
    kernel = functools.partial(fused_kernel, tb=tb, s=seq,
                               head1=head1, head2=head2)
    return pl.pallas_call(
        kernel,
        out_shape=jax.ShapeDtypeStruct((batch, seq, d_out), jnp.float32),
        grid=(batch // tb,),
        in_specs=[pl.BlockSpec((tb, seq, d_in), lambda b: (b, 0, 0))]
                 + [_const_spec(w.shape) for w in flat],
        out_specs=pl.BlockSpec((tb, seq, d_out), lambda b: (b, 0, 0)),
        compiler_params=pltpu.CompilerParams(
            dimension_semantics=("parallel",)),
    )(x, *flat)


# ----------------------------------------------------------------------------
# Deterministic parameter initialization (synthetic; no checkpoint loading)
# ----------------------------------------------------------------------------
def init_params(key, t_dff):
    keys = iter(jax.random.split(key, 64))

    def lin(din, dout):
        return jax.random.normal(next(keys), (din, dout),
                                 jnp.float32) / math.sqrt(din)

    def ln(d):
        return jnp.ones((1, d), jnp.float32), jnp.zeros((1, d), jnp.float32)

    def attn_params(dq, dv, dout):
        g, b = ln(dout)
        return dict(wq=lin(dq, dout), wk=lin(dq, dout), wv=lin(dv, dout),
                    wo=lin(dout, dout), ln_g=g, ln_b=b)

    def ffn_params(d, dff):
        g, b = ln(d)
        return dict(w1=lin(d, d * dff), w2=lin(d * dff, d), ln_g=g, ln_b=b)

    def gate_params(dout, dfor):
        return dict(wg_out=lin(dout, dout), wg_forget=lin(dfor, dout),
                    bg=jnp.zeros((1, dout), jnp.float32))

    return dict(
        # BasicStageAttention(512, 128): SelfAttention2(q_dim=256, out=128, v_dim=512)
        layer1=dict(attn=attn_params(256, 512, 128),
                    ffn=ffn_params(128, t_dff),
                    gate=gate_params(128, 512)),
        # BasicSemAttention(128, 32): SelfAttention2(q_dim=128, out=32, v_dim=128)
        # (its forget gate is unused by the top-level forward -> no gate params)
        layer2=dict(attn=attn_params(128, 128, 32),
                    ffn=ffn_params(32, t_dff)),
    )


if __name__ == "__main__":
    # args: head1 = head2 = 4, t_dff = 2 ; small batch/sequence
    B, S = 2, 8
    head1, head2, t_dff = 4, 4, 2

    root = jax.random.PRNGKey(0)
    k_params, k_x = jax.random.split(root)
    params = init_params(k_params, t_dff)
    x = jax.random.normal(k_x, (B, S, 512), jnp.float32)

    out = sem_attention_ln_transe(x, params, head1, head2)
    out = jax.block_until_ready(out)
    assert out.shape == (B, S, 32), out.shape
    assert bool(jnp.all(jnp.isfinite(out)))
    print("KERNEL_OK")
</pallas_src>

<mosaic_0001>
module attributes {stable_mosaic.version = 11 : i64} {
  func.func @fused_kernel(%arg0: i32, %arg1: memref<1x8x512xf32, #tpu.memory_space<vmem>>, %arg2: memref<512x512xbf16, #tpu.memory_space<vmem>>, %arg3: memref<128x128xbf16, #tpu.memory_space<vmem>>, %arg4: memref<128x256xbf16, #tpu.memory_space<vmem>>, %arg5: memref<256x128xbf16, #tpu.memory_space<vmem>>, %arg6: memref<128x128xbf16, #tpu.memory_space<vmem>>, %arg7: memref<5x128xf32, #tpu.memory_space<vmem>>, %arg8: memref<256x128xbf16, #tpu.memory_space<vmem>>, %arg9: memref<32x32xbf16, #tpu.memory_space<vmem>>, %arg10: memref<32x64xbf16, #tpu.memory_space<vmem>>, %arg11: memref<64x32xbf16, #tpu.memory_space<vmem>>, %arg12: memref<4x32xf32, #tpu.memory_space<vmem>>, %arg13: memref<1x8x32xf32, #tpu.memory_space<vmem>>) attributes {dimension_semantics = [#tpu.dimension_semantics<parallel>], iteration_bounds = array<i64: 2>, scalar_prefetch = 0 : i64, scratch_operands = 0 : i64, tpu.core_type = #tpu.core_type<tc>, window_params = [{transform_indices = @transform_0, window_bounds = array<i64: 1, 8, 512>}, {pipeline_mode = #tpu.pipeline_mode<synchronous>, transform_indices = @transform_1, window_bounds = array<i64: 512, 512>}, {pipeline_mode = #tpu.pipeline_mode<synchronous>, transform_indices = @transform_2, window_bounds = array<i64: 128, 128>}, {pipeline_mode = #tpu.pipeline_mode<synchronous>, transform_indices = @transform_3, window_bounds = array<i64: 128, 256>}, {pipeline_mode = #tpu.pipeline_mode<synchronous>, transform_indices = @transform_4, window_bounds = array<i64: 256, 128>}, {pipeline_mode = #tpu.pipeline_mode<synchronous>, transform_indices = @transform_5, window_bounds = array<i64: 128, 128>}, {pipeline_mode = #tpu.pipeline_mode<synchronous>, transform_indices = @transform_6, window_bounds = array<i64: 5, 128>}, {pipeline_mode = #tpu.pipeline_mode<synchronous>, transform_indices = @transform_7, window_bounds = array<i64: 256, 128>}, {pipeline_mode = #tpu.pipeline_mode<synchronous>, transform_indices = @transform_8, window_bounds = array<i64: 32, 32>}, {pipeline_mode = #tpu.pipeline_mode<synchronous>, transform_indices = @transform_9, window_bounds = array<i64: 32, 64>}, {pipeline_mode = #tpu.pipeline_mode<synchronous>, transform_indices = @transform_10, window_bounds = array<i64: 64, 32>}, {pipeline_mode = #tpu.pipeline_mode<synchronous>, transform_indices = @transform_11, window_bounds = array<i64: 4, 32>}, {transform_indices = @transform_12, window_bounds = array<i64: 1, 8, 32>}]} {
    %c0 = arith.constant 0 : index
    %c0_0 = arith.constant 0 : index
    %c0_1 = arith.constant 0 : index
    %0 = vector.load %arg1[%c0, %c0_0, %c0_1] : memref<1x8x512xf32, #tpu.memory_space<vmem>>, vector<1x8x512xf32>
    %1 = vector.shape_cast %0 : vector<1x8x512xf32> to vector<8x512xf32>
    %c0_2 = arith.constant 0 : index
    %c0_3 = arith.constant 0 : index
    %2 = vector.load %arg7[%c0_2, %c0_3] : memref<5x128xf32, #tpu.memory_space<vmem>>, vector<5x128xf32>
    %c0_4 = arith.constant 0 : index
    %c0_5 = arith.constant 0 : index
    %3 = vector.load %arg12[%c0_4, %c0_5] : memref<4x32xf32, #tpu.memory_space<vmem>>, vector<4x32xf32>
    %4 = arith.truncf %1 : vector<8x512xf32> to vector<8x512xbf16>
    %c0_6 = arith.constant 0 : index
    %c0_7 = arith.constant 0 : index
    %5 = vector.load %arg2[%c0_6, %c0_7] : memref<512x512xbf16, #tpu.memory_space<vmem>>, vector<512x512xbf16>
    %cst = arith.constant dense<0.000000e+00> : vector<8x512xf32>
    %6 = tpu.matmul %4, %5, %cst {dimension_numbers = #tpu.dot_dimension_numbers<[1], [0], [0], [1], [0, 0, 1, 1], [], []>} : vector<8x512xbf16>, vector<512x512xbf16>, vector<8x512xf32> -> vector<8x512xf32>
    %7 = vector.extract_strided_slice %6 {offsets = [0, 0], sizes = [8, 128], strides = [1, 1]} : vector<8x512xf32> to vector<8x128xf32>
    %8 = vector.extract_strided_slice %6 {offsets = [0, 128], sizes = [8, 128], strides = [1, 1]} : vector<8x512xf32> to vector<8x128xf32>
    %9 = vector.extract_strided_slice %6 {offsets = [0, 256], sizes = [8, 128], strides = [1, 1]} : vector<8x512xf32> to vector<8x128xf32>
    %10 = vector.extract_strided_slice %6 {offsets = [0, 384], sizes = [8, 128], strides = [1, 1]} : vector<8x512xf32> to vector<8x128xf32>
    %c0_8 = arith.constant 0 : index
    %c0_9 = arith.constant 0 : index
    %11 = vector.load %arg3[%c0_8, %c0_9] : memref<128x128xbf16, #tpu.memory_space<vmem>>, vector<128x128xbf16>
    %12 = vector.extract_strided_slice %2 {offsets = [0, 0], sizes = [1, 128], strides = [1, 1]} : vector<5x128xf32> to vector<1x128xf32>
    %13 = vector.extract_strided_slice %2 {offsets = [1, 0], sizes = [1, 128], strides = [1, 1]} : vector<5x128xf32> to vector<1x128xf32>
    %14 = vector.shape_cast %7 : vector<8x128xf32> to vector<1x8x128xf32>
    %15 = vector.shape_cast %8 : vector<8x128xf32> to vector<1x8x128xf32>
    %16 = vector.shape_cast %9 : vector<8x128xf32> to vector<1x8x128xf32>
    %17 = vector.extract_strided_slice %14 {offsets = [0, 0, 0], sizes = [1, 8, 32], strides = [1, 1, 1]} : vector<1x8x128xf32> to vector<1x8x32xf32>
    %18 = vector.extract_strided_slice %15 {offsets = [0, 0, 0], sizes = [1, 8, 32], strides = [1, 1, 1]} : vector<1x8x128xf32> to vector<1x8x32xf32>
    %19 = vector.extract_strided_slice %16 {offsets = [0, 0, 0], sizes = [1, 8, 32], strides = [1, 1, 1]} : vector<1x8x128xf32> to vector<1x8x32xf32>
    "tpu.trace_start"() <{level = 10 : i32, message = "bqd,bkd->bqk"}> : () -> ()
    %cst_10 = arith.constant dense<0.000000e+00> : vector<1x8x8xf32>
    %20 = tpu.matmul %17, %18, %cst_10 {dimension_numbers = #tpu.dot_dimension_numbers<[2], [2], [1], [1], [0, 0, 0, 1, 1, 1], [0], [0]>} : vector<1x8x32xf32>, vector<1x8x32xf32>, vector<1x8x8xf32> -> vector<1x8x8xf32>
    "tpu.trace_stop"() : () -> ()
    %cst_11 = arith.constant dense<0xFF800000> : vector<1x8xf32>
    %21 = vector.multi_reduction <maximumf>, %20, %cst_11 [2] : vector<1x8x8xf32> to vector<1x8xf32>
    %22 = vector.shape_cast %21 : vector<1x8xf32> to vector<1x8x1xf32>
    %23 = vector.broadcast %22 : vector<1x8x1xf32> to vector<1x8x8xf32>
    %24 = arith.subf %20, %23 : vector<1x8x8xf32>
    %25 = math.exp %24 : vector<1x8x8xf32>
    %cst_12 = arith.constant dense<0.000000e+00> : vector<1x8xf32>
    %26 = vector.multi_reduction <add>, %25, %cst_12 [2] : vector<1x8x8xf32> to vector<1x8xf32>
    %27 = vector.shape_cast %26 : vector<1x8xf32> to vector<1x8x1xf32>
    %28 = tpu.reciprocal %27 {approx = true} : vector<1x8x1xf32> -> vector<1x8x1xf32>
    %29 = vector.broadcast %28 : vector<1x8x1xf32> to vector<1x8x8xf32>
    %30 = arith.mulf %25, %29 : vector<1x8x8xf32>
    "tpu.trace_start"() <{level = 10 : i32, message = "bqk,bkd->bqd"}> : () -> ()
    %cst_13 = arith.constant dense<0.000000e+00> : vector<1x8x32xf32>
    %31 = tpu.matmul %30, %19, %cst_13 {dimension_numbers = #tpu.dot_dimension_numbers<[2], [1], [1], [2], [0, 0, 0, 1, 1, 2], [0], [0]>} : vector<1x8x8xf32>, vector<1x8x32xf32>, vector<1x8x32xf32> -> vector<1x8x32xf32>
    "tpu.trace_stop"() : () -> ()
    %32 = vector.extract_strided_slice %14 {offsets = [0, 0, 32], sizes = [1, 8, 32], strides = [1, 1, 1]} : vector<1x8x128xf32> to vector<1x8x32xf32>
    %33 = vector.extract_strided_slice %15 {offsets = [0, 0, 32], sizes = [1, 8, 32], strides = [1, 1, 1]} : vector<1x8x128xf32> to vector<1x8x32xf32>
    %34 = vector.extract_strided_slice %16 {offsets = [0, 0, 32], sizes = [1, 8, 32], strides = [1, 1, 1]} : vector<1x8x128xf32> to vector<1x8x32xf32>
    "tpu.trace_start"() <{level = 10 : i32, message = "bqd,bkd->bqk"}> : () -> ()
    %cst_14 = arith.constant dense<0.000000e+00> : vector<1x8x8xf32>
    %35 = tpu.matmul %32, %33, %cst_14 {dimension_numbers = #tpu.dot_dimension_numbers<[2], [2], [1], [1], [0, 0, 0, 1, 1, 1], [0], [0]>} : vector<1x8x32xf32>, vector<1x8x32xf32>, vector<1x8x8xf32> -> vector<1x8x8xf32>
    "tpu.trace_stop"() : () -> ()
    %cst_15 = arith.constant dense<0xFF800000> : vector<1x8xf32>
    %36 = vector.multi_reduction <maximumf>, %35, %cst_15 [2] : vector<1x8x8xf32> to vector<1x8xf32>
    %37 = vector.shape_cast %36 : vector<1x8xf32> to vector<1x8x1xf32>
    %38 = vector.broadcast %37 : vector<1x8x1xf32> to vector<1x8x8xf32>
    %39 = arith.subf %35, %38 : vector<1x8x8xf32>
    %40 = math.exp %39 : vector<1x8x8xf32>
    %cst_16 = arith.constant dense<0.000000e+00> : vector<1x8xf32>
    %41 = vector.multi_reduction <add>, %40, %cst_16 [2] : vector<1x8x8xf32> to vector<1x8xf32>
    %42 = vector.shape_cast %41 : vector<1x8xf32> to vector<1x8x1xf32>
    %43 = tpu.reciprocal %42 {approx = true} : vector<1x8x1xf32> -> vector<1x8x1xf32>
    %44 = vector.broadcast %43 : vector<1x8x1xf32> to vector<1x8x8xf32>
    %45 = arith.mulf %40, %44 : vector<1x8x8xf32>
    "tpu.trace_start"() <{level = 10 : i32, message = "bqk,bkd->bqd"}> : () -> ()
    %cst_17 = arith.constant dense<0.000000e+00> : vector<1x8x32xf32>
    %46 = tpu.matmul %45, %34, %cst_17 {dimension_numbers = #tpu.dot_dimension_numbers<[2], [1], [1], [2], [0, 0, 0, 1, 1, 2], [0], [0]>} : vector<1x8x8xf32>, vector<1x8x32xf32>, vector<1x8x32xf32> -> vector<1x8x32xf32>
    "tpu.trace_stop"() : () -> ()
    %47 = vector.extract_strided_slice %14 {offsets = [0, 0, 64], sizes = [1, 8, 32], strides = [1, 1, 1]} : vector<1x8x128xf32> to vector<1x8x32xf32>
    %48 = vector.extract_strided_slice %15 {offsets = [0, 0, 64], sizes = [1, 8, 32], strides = [1, 1, 1]} : vector<1x8x128xf32> to vector<1x8x32xf32>
    %49 = vector.extract_strided_slice %16 {offsets = [0, 0, 64], sizes = [1, 8, 32], strides = [1, 1, 1]} : vector<1x8x128xf32> to vector<1x8x32xf32>
    "tpu.trace_start"() <{level = 10 : i32, message = "bqd,bkd->bqk"}> : () -> ()
    %cst_18 = arith.constant dense<0.000000e+00> : vector<1x8x8xf32>
    %50 = tpu.matmul %47, %48, %cst_18 {dimension_numbers = #tpu.dot_dimension_numbers<[2], [2], [1], [1], [0, 0, 0, 1, 1, 1], [0], [0]>} : vector<1x8x32xf32>, vector<1x8x32xf32>, vector<1x8x8xf32> -> vector<1x8x8xf32>
    "tpu.trace_stop"() : () -> ()
    %cst_19 = arith.constant dense<0xFF800000> : vector<1x8xf32>
    %51 = vector.multi_reduction <maximumf>, %50, %cst_19 [2] : vector<1x8x8xf32> to vector<1x8xf32>
    %52 = vector.shape_cast %51 : vector<1x8xf32> to vector<1x8x1xf32>
    %53 = vector.broadcast %52 : vector<1x8x1xf32> to vector<1x8x8xf32>
    %54 = arith.subf %50, %53 : vector<1x8x8xf32>
    %55 = math.exp %54 : vector<1x8x8xf32>
    %cst_20 = arith.constant dense<0.000000e+00> : vector<1x8xf32>
    %56 = vector.multi_reduction <add>, %55, %cst_20 [2] : vector<1x8x8xf32> to vector<1x8xf32>
    %57 = vector.shape_cast %56 : vector<1x8xf32> to vector<1x8x1xf32>
    %58 = tpu.reciprocal %57 {approx = true} : vector<1x8x1xf32> -> vector<1x8x1xf32>
    %59 = vector.broadcast %58 : vector<1x8x1xf32> to vector<1x8x8xf32>
    %60 = arith.mulf %55, %59 : vector<1x8x8xf32>
    "tpu.trace_start"() <{level = 10 : i32, message = "bqk,bkd->bqd"}> : () -> ()
    %cst_21 = arith.constant dense<0.000000e+00> : vector<1x8x32xf32>
    %61 = tpu.matmul %60, %49, %cst_21 {dimension_numbers = #tpu.dot_dimension_numbers<[2], [1], [1], [2], [0, 0, 0, 1, 1, 2], [0], [0]>} : vector<1x8x8xf32>, vector<1x8x32xf32>, vector<1x8x32xf32> -> vector<1x8x32xf32>
    "tpu.trace_stop"() : () -> ()
    %62 = vector.extract_strided_slice %14 {offsets = [0, 0, 96], sizes = [1, 8, 32], strides = [1, 1, 1]} : vector<1x8x128xf32> to vector<1x8x32xf32>
    %63 = vector.extract_strided_slice %15 {offsets = [0, 0, 96], sizes = [1, 8, 32], strides = [1, 1, 1]} : vector<1x8x128xf32> to vector<1x8x32xf32>
    %64 = vector.extract_strided_slice %16 {offsets = [0, 0, 96], sizes = [1, 8, 32], strides = [1, 1, 1]} : vector<1x8x128xf32> to vector<1x8x32xf32>
    "tpu.trace_start"() <{level = 10 : i32, message = "bqd,bkd->bqk"}> : () -> ()
    %cst_22 = arith.constant dense<0.000000e+00> : vector<1x8x8xf32>
    %65 = tpu.matmul %62, %63, %cst_22 {dimension_numbers = #tpu.dot_dimension_numbers<[2], [2], [1], [1], [0, 0, 0, 1, 1, 1], [0], [0]>} : vector<1x8x32xf32>, vector<1x8x32xf32>, vector<1x8x8xf32> -> vector<1x8x8xf32>
    "tpu.trace_stop"() : () -> ()
    %cst_23 = arith.constant dense<0xFF800000> : vector<1x8xf32>
    %66 = vector.multi_reduction <maximumf>, %65, %cst_23 [2] : vector<1x8x8xf32> to vector<1x8xf32>
    %67 = vector.shape_cast %66 : vector<1x8xf32> to vector<1x8x1xf32>
    %68 = vector.broadcast %67 : vector<1x8x1xf32> to vector<1x8x8xf32>
    %69 = arith.subf %65, %68 : vector<1x8x8xf32>
    %70 = math.exp %69 : vector<1x8x8xf32>
    %cst_24 = arith.constant dense<0.000000e+00> : vector<1x8xf32>
    %71 = vector.multi_reduction <add>, %70, %cst_24 [2] : vector<1x8x8xf32> to vector<1x8xf32>
    %72 = vector.shape_cast %71 : vector<1x8xf32> to vector<1x8x1xf32>
    %73 = tpu.reciprocal %72 {approx = true} : vector<1x8x1xf32> -> vector<1x8x1xf32>
    %74 = vector.broadcast %73 : vector<1x8x1xf32> to vector<1x8x8xf32>
    %75 = arith.mulf %70, %74 : vector<1x8x8xf32>
    "tpu.trace_start"() <{level = 10 : i32, message = "bqk,bkd->bqd"}> : () -> ()
    %cst_25 = arith.constant dense<0.000000e+00> : vector<1x8x32xf32>
    %76 = tpu.matmul %75, %64, %cst_25 {dimension_numbers = #tpu.dot_dimension_numbers<[2], [1], [1], [2], [0, 0, 0, 1, 1, 2], [0], [0]>} : vector<1x8x8xf32>, vector<1x8x32xf32>, vector<1x8x32xf32> -> vector<1x8x32xf32>
    "tpu.trace_stop"() : () -> ()
    %77 = tpu.concatenate %31, %46, %61, %76 in 2 : vector<1x8x32xf32>, vector<1x8x32xf32>, vector<1x8x32xf32>, vector<1x8x32xf32> -> vector<1x8x128xf32>
    %78 = vector.shape_cast %77 : vector<1x8x128xf32> to vector<8x128xf32>
    %79 = arith.truncf %78 : vector<8x128xf32> to vector<8x128xbf16>
    %cst_26 = arith.constant dense<0.000000e+00> : vector<8x128xf32>
    %80 = tpu.matmul %79, %11, %cst_26 {dimension_numbers = #tpu.dot_dimension_numbers<[1], [0], [0], [1], [0, 0, 1, 1], [], []>} : vector<8x128xbf16>, vector<128x128xbf16>, vector<8x128xf32> -> vector<8x128xf32>
    %81 = arith.addf %80, %9 : vector<8x128xf32>
    %cst_27 = arith.constant dense<0.000000e+00> : vector<8xf32>
    %82 = vector.multi_reduction <add>, %81, %cst_27 [1] : vector<8x128xf32> to vector<8xf32>
    %83 = vector.shape_cast %82 : vector<8xf32> to vector<8x1xf32>
    %cst_28 = arith.constant 1.280000e+02 : f32
    %84 = vector.broadcast %cst_28 : f32 to vector<8x1xf32>
    %85 = arith.divf %83, %84 : vector<8x1xf32>
    %86 = vector.broadcast %85 : vector<8x1xf32> to vector<8x128xf32>
    %87 = arith.subf %81, %86 : vector<8x128xf32>
    %88 = arith.mulf %87, %87 : vector<8x128xf32>
    %cst_29 = arith.constant dense<0.000000e+00> : vector<8xf32>
    %89 = vector.multi_reduction <add>, %88, %cst_29 [1] : vector<8x128xf32> to vector<8xf32>
    %90 = vector.shape_cast %89 : vector<8xf32> to vector<8x1xf32>
    %cst_30 = arith.constant 1.280000e+02 : f32
    %91 = vector.broadcast %cst_30 : f32 to vector<8x1xf32>
    %92 = arith.divf %90, %91 : vector<8x1xf32>
    %cst_31 = arith.constant 9.99999974E-6 : f32
    %93 = vector.broadcast %cst_31 : f32 to vector<8x1xf32>
    %94 = arith.addf %92, %93 : vector<8x1xf32>
    %95 = math.rsqrt %94 : vector<8x1xf32>
    %96 = vector.broadcast %95 : vector<8x1xf32> to vector<8x128xf32>
    %97 = arith.mulf %87, %96 : vector<8x128xf32>
    %98 = vector.broadcast %12 : vector<1x128xf32> to vector<8x128xf32>
    %99 = arith.mulf %97, %98 : vector<8x128xf32>
    %100 = vector.broadcast %13 : vector<1x128xf32> to vector<8x128xf32>
    %101 = arith.addf %99, %100 : vector<8x128xf32>
    %c0_32 = arith.constant 0 : index
    %c0_33 = arith.constant 0 : index
    %102 = vector.load %arg4[%c0_32, %c0_33] : memref<128x256xbf16, #tpu.memory_space<vmem>>, vector<128x256xbf16>
    %c0_34 = arith.constant 0 : index
    %c0_35 = arith.constant 0 : index
    %103 = vector.load %arg5[%c0_34, %c0_35] : memref<256x128xbf16, #tpu.memory_space<vmem>>, vector<256x128xbf16>
    %104 = vector.extract_strided_slice %2 {offsets = [2, 0], sizes = [1, 128], strides = [1, 1]} : vector<5x128xf32> to vector<1x128xf32>
    %105 = vector.extract_strided_slice %2 {offsets = [3, 0], sizes = [1, 128], strides = [1, 1]} : vector<5x128xf32> to vector<1x128xf32>
    %106 = arith.truncf %101 : vector<8x128xf32> to vector<8x128xbf16>
    %cst_36 = arith.constant dense<0.000000e+00> : vector<8x256xf32>
    %107 = tpu.matmul %106, %102, %cst_36 {dimension_numbers = #tpu.dot_dimension_numbers<[1], [0], [0], [1], [0, 0, 1, 1], [], []>} : vector<8x128xbf16>, vector<128x256xbf16>, vector<8x256xf32> -> vector<8x256xf32>
    %cst_37 = arith.constant 0.000000e+00 : f32
    %108 = vector.broadcast %cst_37 : f32 to vector<8x256xf32>
    %109 = arith.maximumf %107, %108 : vector<8x256xf32>
    %110 = arith.truncf %109 : vector<8x256xf32> to vector<8x256xbf16>
    %cst_38 = arith.constant dense<0.000000e+00> : vector<8x128xf32>
    %111 = tpu.matmul %110, %103, %cst_38 {dimension_numbers = #tpu.dot_dimension_numbers<[1], [0], [0], [1], [0, 0, 1, 1], [], []>} : vector<8x256xbf16>, vector<256x128xbf16>, vector<8x128xf32> -> vector<8x128xf32>
    %112 = arith.addf %101, %111 : vector<8x128xf32>
    %cst_39 = arith.constant dense<0.000000e+00> : vector<8xf32>
    %113 = vector.multi_reduction <add>, %112, %cst_39 [1] : vector<8x128xf32> to vector<8xf32>
    %114 = vector.shape_cast %113 : vector<8xf32> to vector<8x1xf32>
    %cst_40 = arith.constant 1.280000e+02 : f32
    %115 = vector.broadcast %cst_40 : f32 to vector<8x1xf32>
    %116 = arith.divf %114, %115 : vector<8x1xf32>
    %117 = vector.broadcast %116 : vector<8x1xf32> to vector<8x128xf32>
    %118 = arith.subf %112, %117 : vector<8x128xf32>
    %119 = arith.mulf %118, %118 : vector<8x128xf32>
    %cst_41 = arith.constant dense<0.000000e+00> : vector<8xf32>
    %120 = vector.multi_reduction <add>, %119, %cst_41 [1] : vector<8x128xf32> to vector<8xf32>
    %121 = vector.shape_cast %120 : vector<8xf32> to vector<8x1xf32>
    %cst_42 = arith.constant 1.280000e+02 : f32
    %122 = vector.broadcast %cst_42 : f32 to vector<8x1xf32>
    %123 = arith.divf %121, %122 : vector<8x1xf32>
    %cst_43 = arith.constant 9.99999974E-6 : f32
    %124 = vector.broadcast %cst_43 : f32 to vector<8x1xf32>
    %125 = arith.addf %123, %124 : vector<8x1xf32>
    %126 = math.rsqrt %125 : vector<8x1xf32>
    %127 = vector.broadcast %126 : vector<8x1xf32> to vector<8x128xf32>
    %128 = arith.mulf %118, %127 : vector<8x128xf32>
    %129 = vector.broadcast %104 : vector<1x128xf32> to vector<8x128xf32>
    %130 = arith.mulf %128, %129 : vector<8x128xf32>
    %131 = vector.broadcast %105 : vector<1x128xf32> to vector<8x128xf32>
    %132 = arith.addf %130, %131 : vector<8x128xf32>
    %133 = arith.truncf %132 : vector<8x128xf32> to vector<8x128xbf16>
    %c0_44 = arith.constant 0 : index
    %c0_45 = arith.constant 0 : index
    %134 = vector.load %arg6[%c0_44, %c0_45] : memref<128x128xbf16, #tpu.memory_space<vmem>>, vector<128x128xbf16>
    %cst_46 = arith.constant dense<0.000000e+00> : vector<8x128xf32>
    %135 = tpu.matmul %133, %134, %cst_46 {dimension_numbers = #tpu.dot_dimension_numbers<[1], [0], [0], [1], [0, 0, 1, 1], [], []>} : vector<8x128xbf16>, vector<128x128xbf16>, vector<8x128xf32> -> vector<8x128xf32>
    %136 = arith.addf %135, %10 : vector<8x128xf32>
    %137 = vector.extract_strided_slice %2 {offsets = [4, 0], sizes = [1, 128], strides = [1, 1]} : vector<5x128xf32> to vector<1x128xf32>
    %138 = vector.broadcast %137 : vector<1x128xf32> to vector<8x128xf32>
    %139 = arith.addf %136, %138 : vector<8x128xf32>
    %140 = arith.negf %139 : vector<8x128xf32>
    %141 = math.exp %140 : vector<8x128xf32>
    %cst_47 = arith.constant 1.000000e+00 : f32
    %142 = vector.broadcast %cst_47 : f32 to vector<8x128xf32>
    %143 = arith.addf %142, %141 : vector<8x128xf32>
    %144 = arith.divf %142, %143 : vector<8x128xf32>
    %145 = arith.mulf %132, %144 : vector<8x128xf32>
    %146 = tpu.concatenate %132, %145 in 1 : vector<8x128xf32>, vector<8x128xf32> -> vector<8x256xf32>
    %147 = arith.truncf %146 : vector<8x256xf32> to vector<8x256xbf16>
    %c0_48 = arith.constant 0 : index
    %c0_49 = arith.constant 0 : index
    %148 = vector.load %arg8[%c0_48, %c0_49] : memref<256x128xbf16, #tpu.memory_space<vmem>>, vector<256x128xbf16>
    %cst_50 = arith.constant dense<0.000000e+00> : vector<8x128xf32>
    %149 = tpu.matmul %147, %148, %cst_50 {dimension_numbers = #tpu.dot_dimension_numbers<[1], [0], [0], [1], [0, 0, 1, 1], [], []>} : vector<8x256xbf16>, vector<256x128xbf16>, vector<8x128xf32> -> vector<8x128xf32>
    %150 = vector.extract_strided_slice %149 {offsets = [0, 0], sizes = [8, 32], strides = [1, 1]} : vector<8x128xf32> to vector<8x32xf32>
    %151 = vector.extract_strided_slice %149 {offsets = [0, 32], sizes = [8, 32], strides = [1, 1]} : vector<8x128xf32> to vector<8x32xf32>
    %152 = vector.extract_strided_slice %149 {offsets = [0, 64], sizes = [8, 32], strides = [1, 1]} : vector<8x128xf32> to vector<8x32xf32>
    %c0_51 = arith.constant 0 : index
    %c0_52 = arith.constant 0 : index
    %153 = vector.load %arg9[%c0_51, %c0_52] : memref<32x32xbf16, #tpu.memory_space<vmem>>, vector<32x32xbf16>
    %154 = vector.extract_strided_slice %3 {offsets = [0, 0], sizes = [1, 32], strides = [1, 1]} : vector<4x32xf32> to vector<1x32xf32>
    %155 = vector.extract_strided_slice %3 {offsets = [1, 0], sizes = [1, 32], strides = [1, 1]} : vector<4x32xf32> to vector<1x32xf32>
    %156 = vector.shape_cast %150 : vector<8x32xf32> to vector<1x8x32xf32>
    %157 = vector.shape_cast %151 : vector<8x32xf32> to vector<1x8x32xf32>
    %158 = vector.shape_cast %152 : vector<8x32xf32> to vector<1x8x32xf32>
    %159 = vector.extract_strided_slice %156 {offsets = [0, 0, 0], sizes = [1, 8, 8], strides = [1, 1, 1]} : vector<1x8x32xf32> to vector<1x8x8xf32>
    %160 = vector.extract_strided_slice %157 {offsets = [0, 0, 0], sizes = [1, 8, 8], strides = [1, 1, 1]} : vector<1x8x32xf32> to vector<1x8x8xf32>
    %161 = vector.extract_strided_slice %158 {offsets = [0, 0, 0], sizes = [1, 8, 8], strides = [1, 1, 1]} : vector<1x8x32xf32> to vector<1x8x8xf32>
    "tpu.trace_start"() <{level = 10 : i32, message = "bqd,bkd->bqk"}> : () -> ()
    %cst_53 = arith.constant dense<0.000000e+00> : vector<1x8x8xf32>
    %162 = tpu.matmul %159, %160, %cst_53 {dimension_numbers = #tpu.dot_dimension_numbers<[2], [2], [1], [1], [0, 0, 0, 1, 1, 1], [0], [0]>} : vector<1x8x8xf32>, vector<1x8x8xf32>, vector<1x8x8xf32> -> vector<1x8x8xf32>
    "tpu.trace_stop"() : () -> ()
    %cst_54 = arith.constant dense<0xFF800000> : vector<1x8xf32>
    %163 = vector.multi_reduction <maximumf>, %162, %cst_54 [2] : vector<1x8x8xf32> to vector<1x8xf32>
    %164 = vector.shape_cast %163 : vector<1x8xf32> to vector<1x8x1xf32>
    %165 = vector.broadcast %164 : vector<1x8x1xf32> to vector<1x8x8xf32>
    %166 = arith.subf %162, %165 : vector<1x8x8xf32>
    %167 = math.exp %166 : vector<1x8x8xf32>
    %cst_55 = arith.constant dense<0.000000e+00> : vector<1x8xf32>
    %168 = vector.multi_reduction <add>, %167, %cst_55 [2] : vector<1x8x8xf32> to vector<1x8xf32>
    %169 = vector.shape_cast %168 : vector<1x8xf32> to vector<1x8x1xf32>
    %170 = tpu.reciprocal %169 {approx = true} : vector<1x8x1xf32> -> vector<1x8x1xf32>
    %171 = vector.broadcast %170 : vector<1x8x1xf32> to vector<1x8x8xf32>
    %172 = arith.mulf %167, %171 : vector<1x8x8xf32>
    "tpu.trace_start"() <{level = 10 : i32, message = "bqk,bkd->bqd"}> : () -> ()
    %cst_56 = arith.constant dense<0.000000e+00> : vector<1x8x8xf32>
    %173 = tpu.matmul %172, %161, %cst_56 {dimension_numbers = #tpu.dot_dimension_numbers<[2], [1], [1], [2], [0, 0, 0, 1, 1, 2], [0], [0]>} : vector<1x8x8xf32>, vector<1x8x8xf32>, vector<1x8x8xf32> -> vector<1x8x8xf32>
    "tpu.trace_stop"() : () -> ()
    %174 = vector.extract_strided_slice %156 {offsets = [0, 0, 8], sizes = [1, 8, 8], strides = [1, 1, 1]} : vector<1x8x32xf32> to vector<1x8x8xf32>
    %175 = vector.extract_strided_slice %157 {offsets = [0, 0, 8], sizes = [1, 8, 8], strides = [1, 1, 1]} : vector<1x8x32xf32> to vector<1x8x8xf32>
    %176 = vector.extract_strided_slice %158 {offsets = [0, 0, 8], sizes = [1, 8, 8], strides = [1, 1, 1]} : vector<1x8x32xf32> to vector<1x8x8xf32>
    "tpu.trace_start"() <{level = 10 : i32, message = "bqd,bkd->bqk"}> : () -> ()
    %cst_57 = arith.constant dense<0.000000e+00> : vector<1x8x8xf32>
    %177 = tpu.matmul %174, %175, %cst_57 {dimension_numbers = #tpu.dot_dimension_numbers<[2], [2], [1], [1], [0, 0, 0, 1, 1, 1], [0], [0]>} : vector<1x8x8xf32>, vector<1x8x8xf32>, vector<1x8x8xf32> -> vector<1x8x8xf32>
    "tpu.trace_stop"() : () -> ()
    %cst_58 = arith.constant dense<0xFF800000> : vector<1x8xf32>
    %178 = vector.multi_reduction <maximumf>, %177, %cst_58 [2] : vector<1x8x8xf32> to vector<1x8xf32>
    %179 = vector.shape_cast %178 : vector<1x8xf32> to vector<1x8x1xf32>
    %180 = vector.broadcast %179 : vector<1x8x1xf32> to vector<1x8x8xf32>
    %181 = arith.subf %177, %180 : vector<1x8x8xf32>
    %182 = math.exp %181 : vector<1x8x8xf32>
    %cst_59 = arith.constant dense<0.000000e+00> : vector<1x8xf32>
    %183 = vector.multi_reduction <add>, %182, %cst_59 [2] : vector<1x8x8xf32> to vector<1x8xf32>
    %184 = vector.shape_cast %183 : vector<1x8xf32> to vector<1x8x1xf32>
    %185 = tpu.reciprocal %184 {approx = true} : vector<1x8x1xf32> -> vector<1x8x1xf32>
    %186 = vector.broadcast %185 : vector<1x8x1xf32> to vector<1x8x8xf32>
    %187 = arith.mulf %182, %186 : vector<1x8x8xf32>
    "tpu.trace_start"() <{level = 10 : i32, message = "bqk,bkd->bqd"}> : () -> ()
    %cst_60 = arith.constant dense<0.000000e+00> : vector<1x8x8xf32>
    %188 = tpu.matmul %187, %176, %cst_60 {dimension_numbers = #tpu.dot_dimension_numbers<[2], [1], [1], [2], [0, 0, 0, 1, 1, 2], [0], [0]>} : vector<1x8x8xf32>, vector<1x8x8xf32>, vector<1x8x8xf32> -> vector<1x8x8xf32>
    "tpu.trace_stop"() : () -> ()
    %189 = vector.extract_strided_slice %156 {offsets = [0, 0, 16], sizes = [1, 8, 8], strides = [1, 1, 1]} : vector<1x8x32xf32> to vector<1x8x8xf32>
    %190 = vector.extract_strided_slice %157 {offsets = [0, 0, 16], sizes = [1, 8, 8], strides = [1, 1, 1]} : vector<1x8x32xf32> to vector<1x8x8xf32>
    %191 = vector.extract_strided_slice %158 {offsets = [0, 0, 16], sizes = [1, 8, 8], strides = [1, 1, 1]} : vector<1x8x32xf32> to vector<1x8x8xf32>
    "tpu.trace_start"() <{level = 10 : i32, message = "bqd,bkd->bqk"}> : () -> ()
    %cst_61 = arith.constant dense<0.000000e+00> : vector<1x8x8xf32>
    %192 = tpu.matmul %189, %190, %cst_61 {dimension_numbers = #tpu.dot_dimension_numbers<[2], [2], [1], [1], [0, 0, 0, 1, 1, 1], [0], [0]>} : vector<1x8x8xf32>, vector<1x8x8xf32>, vector<1x8x8xf32> -> vector<1x8x8xf32>
    "tpu.trace_stop"() : () -> ()
    %cst_62 = arith.constant dense<0xFF800000> : vector<1x8xf32>
    %193 = vector.multi_reduction <maximumf>, %192, %cst_62 [2] : vector<1x8x8xf32> to vector<1x8xf32>
    %194 = vector.shape_cast %193 : vector<1x8xf32> to vector<1x8x1xf32>
    %195 = vector.broadcast %194 : vector<1x8x1xf32> to vector<1x8x8xf32>
    %196 = arith.subf %192, %195 : vector<1x8x8xf32>
    %197 = math.exp %196 : vector<1x8x8xf32>
    %cst_63 = arith.constant dense<0.000000e+00> : vector<1x8xf32>
    %198 = vector.multi_reduction <add>, %197, %cst_63 [2] : vector<1x8x8xf32> to vector<1x8xf32>
    %199 = vector.shape_cast %198 : vector<1x8xf32> to vector<1x8x1xf32>
    %200 = tpu.reciprocal %199 {approx = true} : vector<1x8x1xf32> -> vector<1x8x1xf32>
    %201 = vector.broadcast %200 : vector<1x8x1xf32> to vector<1x8x8xf32>
    %202 = arith.mulf %197, %201 : vector<1x8x8xf32>
    "tpu.trace_start"() <{level = 10 : i32, message = "bqk,bkd->bqd"}> : () -> ()
    %cst_64 = arith.constant dense<0.000000e+00> : vector<1x8x8xf32>
    %203 = tpu.matmul %202, %191, %cst_64 {dimension_numbers = #tpu.dot_dimension_numbers<[2], [1], [1], [2], [0, 0, 0, 1, 1, 2], [0], [0]>} : vector<1x8x8xf32>, vector<1x8x8xf32>, vector<1x8x8xf32> -> vector<1x8x8xf32>
    "tpu.trace_stop"() : () -> ()
    %204 = vector.extract_strided_slice %156 {offsets = [0, 0, 24], sizes = [1, 8, 8], strides = [1, 1, 1]} : vector<1x8x32xf32> to vector<1x8x8xf32>
    %205 = vector.extract_strided_slice %157 {offsets = [0, 0, 24], sizes = [1, 8, 8], strides = [1, 1, 1]} : vector<1x8x32xf32> to vector<1x8x8xf32>
    %206 = vector.extract_strided_slice %158 {offsets = [0, 0, 24], sizes = [1, 8, 8], strides = [1, 1, 1]} : vector<1x8x32xf32> to vector<1x8x8xf32>
    "tpu.trace_start"() <{level = 10 : i32, message = "bqd,bkd->bqk"}> : () -> ()
    %cst_65 = arith.constant dense<0.000000e+00> : vector<1x8x8xf32>
    %207 = tpu.matmul %204, %205, %cst_65 {dimension_numbers = #tpu.dot_dimension_numbers<[2], [2], [1], [1], [0, 0, 0, 1, 1, 1], [0], [0]>} : vector<1x8x8xf32>, vector<1x8x8xf32>, vector<1x8x8xf32> -> vector<1x8x8xf32>
    "tpu.trace_stop"() : () -> ()
    %cst_66 = arith.constant dense<0xFF800000> : vector<1x8xf32>
    %208 = vector.multi_reduction <maximumf>, %207, %cst_66 [2] : vector<1x8x8xf32> to vector<1x8xf32>
    %209 = vector.shape_cast %208 : vector<1x8xf32> to vector<1x8x1xf32>
    %210 = vector.broadcast %209 : vector<1x8x1xf32> to vector<1x8x8xf32>
    %211 = arith.subf %207, %210 : vector<1x8x8xf32>
    %212 = math.exp %211 : vector<1x8x8xf32>
    %cst_67 = arith.constant dense<0.000000e+00> : vector<1x8xf32>
    %213 = vector.multi_reduction <add>, %212, %cst_67 [2] : vector<1x8x8xf32> to vector<1x8xf32>
    %214 = vector.shape_cast %213 : vector<1x8xf32> to vector<1x8x1xf32>
    %215 = tpu.reciprocal %214 {approx = true} : vector<1x8x1xf32> -> vector<1x8x1xf32>
    %216 = vector.broadcast %215 : vector<1x8x1xf32> to vector<1x8x8xf32>
    %217 = arith.mulf %212, %216 : vector<1x8x8xf32>
    "tpu.trace_start"() <{level = 10 : i32, message = "bqk,bkd->bqd"}> : () -> ()
    %cst_68 = arith.constant dense<0.000000e+00> : vector<1x8x8xf32>
    %218 = tpu.matmul %217, %206, %cst_68 {dimension_numbers = #tpu.dot_dimension_numbers<[2], [1], [1], [2], [0, 0, 0, 1, 1, 2], [0], [0]>} : vector<1x8x8xf32>, vector<1x8x8xf32>, vector<1x8x8xf32> -> vector<1x8x8xf32>
    "tpu.trace_stop"() : () -> ()
    %219 = tpu.concatenate %173, %188, %203, %218 in 2 : vector<1x8x8xf32>, vector<1x8x8xf32>, vector<1x8x8xf32>, vector<1x8x8xf32> -> vector<1x8x32xf32>
    %220 = vector.shape_cast %219 : vector<1x8x32xf32> to vector<8x32xf32>
    %221 = arith.truncf %220 : vector<8x32xf32> to vector<8x32xbf16>
    %cst_69 = arith.constant dense<0.000000e+00> : vector<8x32xf32>
    %222 = tpu.matmul %221, %153, %cst_69 {dimension_numbers = #tpu.dot_dimension_numbers<[1], [0], [0], [1], [0, 0, 1, 1], [], []>} : vector<8x32xbf16>, vector<32x32xbf16>, vector<8x32xf32> -> vector<8x32xf32>
    %223 = arith.addf %222, %152 : vector<8x32xf32>
    %cst_70 = arith.constant dense<0.000000e+00> : vector<8xf32>
    %224 = vector.multi_reduction <add>, %223, %cst_70 [1] : vector<8x32xf32> to vector<8xf32>
    %225 = vector.shape_cast %224 : vector<8xf32> to vector<8x1xf32>
    %cst_71 = arith.constant 3.200000e+01 : f32
    %226 = vector.broadcast %cst_71 : f32 to vector<8x1xf32>
    %227 = arith.divf %225, %226 : vector<8x1xf32>
    %228 = vector.broadcast %227 : vector<8x1xf32> to vector<8x32xf32>
    %229 = arith.subf %223, %228 : vector<8x32xf32>
    %230 = arith.mulf %229, %229 : vector<8x32xf32>
    %cst_72 = arith.constant dense<0.000000e+00> : vector<8xf32>
    %231 = vector.multi_reduction <add>, %230, %cst_72 [1] : vector<8x32xf32> to vector<8xf32>
    %232 = vector.shape_cast %231 : vector<8xf32> to vector<8x1xf32>
    %cst_73 = arith.constant 3.200000e+01 : f32
    %233 = vector.broadcast %cst_73 : f32 to vector<8x1xf32>
    %234 = arith.divf %232, %233 : vector<8x1xf32>
    %cst_74 = arith.constant 9.99999974E-6 : f32
    %235 = vector.broadcast %cst_74 : f32 to vector<8x1xf32>
    %236 = arith.addf %234, %235 : vector<8x1xf32>
    %237 = math.rsqrt %236 : vector<8x1xf32>
    %238 = vector.broadcast %237 : vector<8x1xf32> to vector<8x32xf32>
    %239 = arith.mulf %229, %238 : vector<8x32xf32>
    %240 = vector.broadcast %154 : vector<1x32xf32> to vector<8x32xf32>
    %241 = arith.mulf %239, %240 : vector<8x32xf32>
    %242 = vector.broadcast %155 : vector<1x32xf32> to vector<8x32xf32>
    %243 = arith.addf %241, %242 : vector<8x32xf32>
    %c0_75 = arith.constant 0 : index
    %c0_76 = arith.constant 0 : index
    %244 = vector.load %arg10[%c0_75, %c0_76] : memref<32x64xbf16, #tpu.memory_space<vmem>>, vector<32x64xbf16>
    %c0_77 = arith.constant 0 : index
    %c0_78 = arith.constant 0 : index
    %245 = vector.load %arg11[%c0_77, %c0_78] : memref<64x32xbf16, #tpu.memory_space<vmem>>, vector<64x32xbf16>
    %246 = vector.extract_strided_slice %3 {offsets = [2, 0], sizes = [1, 32], strides = [1, 1]} : vector<4x32xf32> to vector<1x32xf32>
    %247 = vector.extract_strided_slice %3 {offsets = [3, 0], sizes = [1, 32], strides = [1, 1]} : vector<4x32xf32> to vector<1x32xf32>
    %248 = arith.truncf %243 : vector<8x32xf32> to vector<8x32xbf16>
    %cst_79 = arith.constant dense<0.000000e+00> : vector<8x64xf32>
    %249 = tpu.matmul %248, %244, %cst_79 {dimension_numbers = #tpu.dot_dimension_numbers<[1], [0], [0], [1], [0, 0, 1, 1], [], []>} : vector<8x32xbf16>, vector<32x64xbf16>, vector<8x64xf32> -> vector<8x64xf32>
    %cst_80 = arith.constant 0.000000e+00 : f32
    %250 = vector.broadcast %cst_80 : f32 to vector<8x64xf32>
    %251 = arith.maximumf %249, %250 : vector<8x64xf32>
    %252 = arith.truncf %251 : vector<8x64xf32> to vector<8x64xbf16>
    %cst_81 = arith.constant dense<0.000000e+00> : vector<8x32xf32>
    %253 = tpu.matmul %252, %245, %cst_81 {dimension_numbers = #tpu.dot_dimension_numbers<[1], [0], [0], [1], [0, 0, 1, 1], [], []>} : vector<8x64xbf16>, vector<64x32xbf16>, vector<8x32xf32> -> vector<8x32xf32>
    %254 = arith.addf %243, %253 : vector<8x32xf32>
    %cst_82 = arith.constant dense<0.000000e+00> : vector<8xf32>
    %255 = vector.multi_reduction <add>, %254, %cst_82 [1] : vector<8x32xf32> to vector<8xf32>
    %256 = vector.shape_cast %255 : vector<8xf32> to vector<8x1xf32>
    %cst_83 = arith.constant 3.200000e+01 : f32
    %257 = vector.broadcast %cst_83 : f32 to vector<8x1xf32>
    %258 = arith.divf %256, %257 : vector<8x1xf32>
    %259 = vector.broadcast %258 : vector<8x1xf32> to vector<8x32xf32>
    %260 = arith.subf %254, %259 : vector<8x32xf32>
    %261 = arith.mulf %260, %260 : vector<8x32xf32>
    %cst_84 = arith.constant dense<0.000000e+00> : vector<8xf32>
    %262 = vector.multi_reduction <add>, %261, %cst_84 [1] : vector<8x32xf32> to vector<8xf32>
    %263 = vector.shape_cast %262 : vector<8xf32> to vector<8x1xf32>
    %cst_85 = arith.constant 3.200000e+01 : f32
    %264 = vector.broadcast %cst_85 : f32 to vector<8x1xf32>
    %265 = arith.divf %263, %264 : vector<8x1xf32>
    %cst_86 = arith.constant 9.99999974E-6 : f32
    %266 = vector.broadcast %cst_86 : f32 to vector<8x1xf32>
    %267 = arith.addf %265, %266 : vector<8x1xf32>
    %268 = math.rsqrt %267 : vector<8x1xf32>
    %269 = vector.broadcast %268 : vector<8x1xf32> to vector<8x32xf32>
    %270 = arith.mulf %260, %269 : vector<8x32xf32>
    %271 = vector.broadcast %246 : vector<1x32xf32> to vector<8x32xf32>
    %272 = arith.mulf %270, %271 : vector<8x32xf32>
    %273 = vector.broadcast %247 : vector<1x32xf32> to vector<8x32xf32>
    %274 = arith.addf %272, %273 : vector<8x32xf32>
    %275 = vector.shape_cast %274 : vector<8x32xf32> to vector<1x8x32xf32>
    %c0_87 = arith.constant 0 : index
    %c0_88 = arith.constant 0 : index
    %c0_89 = arith.constant 0 : index
    %276 = vector.load %arg13[%c0_87, %c0_88, %c0_89] : memref<1x8x32xf32, #tpu.memory_space<vmem>>, vector<1x8x32xf32>
    tpu.vector_store %arg13[%c0_87, %c0_88, %c0_89], %275 {strides = array<i32>} : memref<1x8x32xf32, #tpu.memory_space<vmem>>, vector<1x8x32xf32>,
    return
  }
  func.func @transform_0(%arg0: i32) -> (i32, i32, i32) {
    %c0_i32 = arith.constant 0 : i32
    %c0_i32_0 = arith.constant 0 : i32
    %c0_i32_1 = arith.constant 0 : i32
    return %arg0, %c0_i32, %c0_i32_0 : i32, i32, i32
  }
  func.func @transform_1(%arg0: i32) -> (i32, i32) {
    %c0_i32 = arith.constant 0 : i32
    %c0_i32_0 = arith.constant 0 : i32
    %c0_i32_1 = arith.constant 0 : i32
    return %c0_i32, %c0_i32_0 : i32, i32
  }
  func.func @transform_2(%arg0: i32) -> (i32, i32) {
    %c0_i32 = arith.constant 0 : i32
    %c0_i32_0 = arith.constant 0 : i32
    %c0_i32_1 = arith.constant 0 : i32
    return %c0_i32, %c0_i32_0 : i32, i32
  }
  func.func @transform_3(%arg0: i32) -> (i32, i32) {
    %c0_i32 = arith.constant 0 : i32
    %c0_i32_0 = arith.constant 0 : i32
    %c0_i32_1 = arith.constant 0 : i32
    return %c0_i32, %c0_i32_0 : i32, i32
  }
  func.func @transform_4(%arg0: i32) -> (i32, i32) {
    %c0_i32 = arith.constant 0 : i32
    %c0_i32_0 = arith.constant 0 : i32
    %c0_i32_1 = arith.constant 0 : i32
    return %c0_i32, %c0_i32_0 : i32, i32
  }
  func.func @transform_5(%arg0: i32) -> (i32, i32) {
    %c0_i32 = arith.constant 0 : i32
    %c0_i32_0 = arith.constant 0 : i32
    %c0_i32_1 = arith.constant 0 : i32
    return %c0_i32, %c0_i32_0 : i32, i32
  }
  func.func @transform_6(%arg0: i32) -> (i32, i32) {
    %c0_i32 = arith.constant 0 : i32
    %c0_i32_0 = arith.constant 0 : i32
    %c0_i32_1 = arith.constant 0 : i32
    return %c0_i32, %c0_i32_0 : i32, i32
  }
  func.func @transform_7(%arg0: i32) -> (i32, i32) {
    %c0_i32 = arith.constant 0 : i32
    %c0_i32_0 = arith.constant 0 : i32
    %c0_i32_1 = arith.constant 0 : i32
    return %c0_i32, %c0_i32_0 : i32, i32
  }
  func.func @transform_8(%arg0: i32) -> (i32, i32) {
    %c0_i32 = arith.constant 0 : i32
    %c0_i32_0 = arith.constant 0 : i32
    %c0_i32_1 = arith.constant 0 : i32
    return %c0_i32, %c0_i32_0 : i32, i32
  }
  func.func @transform_9(%arg0: i32) -> (i32, i32) {
    %c0_i32 = arith.constant 0 : i32
    %c0_i32_0 = arith.constant 0 : i32
    %c0_i32_1 = arith.constant 0 : i32
    return %c0_i32, %c0_i32_0 : i32, i32
  }
  func.func @transform_10(%arg0: i32) -> (i32, i32) {
    %c0_i32 = arith.constant 0 : i32
    %c0_i32_0 = arith.constant 0 : i32
    %c0_i32_1 = arith.constant 0 : i32
    return %c0_i32, %c0_i32_0 : i32, i32
  }
  func.func @transform_11(%arg0: i32) -> (i32, i32) {
    %c0_i32 = arith.constant 0 : i32
    %c0_i32_0 = arith.constant 0 : i32
    %c0_i32_1 = arith.constant 0 : i32
    return %c0_i32, %c0_i32_0 : i32, i32
  }
  func.func @transform_12(%arg0: i32) -> (i32, i32, i32) {
    %c0_i32 = arith.constant 0 : i32
    %c0_i32_0 = arith.constant 0 : i32
    %c0_i32_1 = arith.constant 0 : i32
    return %arg0, %c0_i32, %c0_i32_0 : i32, i32, i32
  }
}

</mosaic_0001>

<bundles_post_ra>
// kernel: tpu_custom_call.1
= control target key start
LH: loop header
LB: loop body
LE: loop exit
PB: predicated region body
PF: predicated region fallthrough
CT: control target
= control target key end

     0   :  { %s5972_s0 = inlined_call_operand.hbm [shape: f32[2,8,512], index: 0, kind: input, shape index: {}]   ;;  %s5973_s1 = inlined_call_operand.hbm [shape: bf16[512,512], index: 1, kind: input, shape index: {}]   ;;  %s5974_s2 = inlined_call_operand.hbm [shape: bf16[128,128], index: 2, kind: input, shape index: {}]   ;;  %s5975_s3 = inlined_call_operand.hbm [shape: bf16[128,256], index: 3, kind: input, shape index: {}]   ;;  %s5976_s4 = inlined_call_operand.hbm [shape: bf16[256,128], index: 4, kind: input, shape index: {}]   ;;  %s5977_s5 = inlined_call_operand.vmem [shape: bf16[128,128], index: 5, kind: input, shape index: {}]   ;;  %s5978_s6 = inlined_call_operand.hbm [shape: f32[5,128], index: 6, kind: input, shape index: {}]   ;;  %s5979_s7 = inlined_call_operand.hbm [shape: bf16[256,128], index: 7, kind: input, shape index: {}]   ;;  %s5980_s8 = inlined_call_operand.hbm [shape: bf16[32,32], index: 8, kind: input, shape index: {}]   ;;  %s5981_s9 = inlined_call_operand.vmem [shape: bf16[32,64], index: 9, kind: input, shape index: {}]   ;;  %s5982_s10 = inlined_call_operand.vmem [shape: bf16[64,32], index: 10, kind: input, shape index: {}]   ;;  %s5983_s11 = inlined_call_operand.vmem [shape: f32[4,32], index: 11, kind: input, shape index: {}]   ;;  %s5984_s12 = inlined_call_operand.hbm [shape: f32[2,8,32], index: 12, kind: output, shape index: {}]  }
   0x1   :  { %5991 = sst [smem:[#allocation23_spill]] %s5972_s0 }
   0x2   :  { %5992 = sst [smem:[#allocation24_spill]] %s5981_s9 }
   0x3   :  { %5993 = sst [smem:[#allocation25_spill]] %s5982_s10 }
   0x4   :  { %5994 = sst [smem:[#allocation26_spill]] %s5983_s11 }
   0x5   :  { %5995 = sst [smem:[#allocation27_spill]] %s5984_s12 }
   0x6   :  { %17 = vsyncpa [#allocation3], 0 }
   0x7   :  { %19 = vsyncpa [#allocation3 + $0x1], 0 }
   0x8   :  { %20 = vsyncpa [#allocation6], 0 }
   0x9   :  { %21 = vsyncpa [#allocation9], 0 }
   0xa   :  { %22 = vsyncpa [#allocation12], 0 }
   0xb   :  { %23 = vsyncpa [#allocation15], 0 }
   0xc   :  { %24 = vsyncpa [#allocation4], 0 }
   0xd   :  { %26 = vsyncpa [#allocation4 + $0x1], 0  ;;  %s5348_s21 = smov 0   ;;  %s5350_s22 = smov 0  }
   0xe   :  { %s5352_s23 = smov 0   ;;  %s5354_s24 = smov 0  }
   0xf LB: > { %s5250_s25 = smov [#allocation5]   ;;  %s5369_s27 = sadd.s32 4294967295, %s5248_s24   ;;  %s5248_s24 = sphi %s5354_s24, %s6024_s24   ;;  %s5244_s23 = sphi %s5352_s23, %s6023_s23   ;;  %s5240_s22 = sphi %s5350_s22, %s6022_s22   ;;  %s5236_s21 = sphi %s5348_s21, %s6021_s21  }
  0x10   : > { %s332_s26 = sshll.u32 %s5250_s25, 4  ;;  %p3967_p0 = scmp.ge.s32.totalorder %s5248_s24, 1  ;;  %s5374_s26 = int_to_ptr.vmem [resolvable:$true] %s332_s26 }
  0x11   : > { %p5988_p1 = scmp.eq.s32.totalorder %s5369_s27, 0  ;;  %p320_p2 = scmp.lt.s32.totalorder %s5248_s24, 3 }
  0x12   : > { %s5251_s29 = smov [#allocation8]   ;;  %s5252_s14 = smov [#allocation11]  }
  0x13   : > { %p5376_p3 = pnand %p3967_p0, %p320_p2  ;;  %s358_s30 = sshll.u32 %s5251_s29, 4  ;;  %s5389_s30 = int_to_ptr.vmem [resolvable:$true] %s358_s30 }
  0x14   : > { %s5391_s15 = sshll.u32 %s5252_s14, 4  ;;  %s4940_s18 = scalar_lea.hbm %s5973_s1, 16384  ;;  %s389_s15 = int_to_ptr.vmem [resolvable:$true] %s5391_s15 }
  0x15   : > { %s5996_s28 = scalar_select %p5376_p3, 1, 0 }
  0x16   : > { %p4515_p5 = pneg %p5376_p3  ;;  %p4941_p7 = scmp.ne.s32.totalorder %s5973_s1, %s4940_s18 }
  0x17   : > { %p4947_p11 = scmp.lt.u32.totalorder %s4940_s18, %s5973_s1 }
  0x18   : > { %p5385_p6 = pnand %p4515_p5, %p5988_p1 }
  0x1a   : > { %p5401_p8 = pneg %p5385_p6 }
  0x1c   : > { %p4943_p9 = pnand %p5401_p8, %p4941_p7 }
  0x1e   : > { %p4944_p10 = pneg %p4943_p9 }
  0x20   : > { %p4949_p12 = pnand %p4947_p11, %p4944_p10 }
  0x22   : > { %4952 = shalt.err (!%p4949_p12)
}
  0x23   : > { %s4953_s16 = scalar_lea.vmem %s5374_s26, 16384  ;;  %p4961_p5 = scmp.lt.s32.totalorder %s5374_s26, %s5374_s26 }
  0x24   : > { %p4954_p13 = scmp.ne.s32.totalorder %s5374_s26, %s4953_s16  ;;  %p4962_p4 = scmp.lt.s32.totalorder %s4953_s16, %s4953_s16 }
  0x26   : > { %p4956_p0 = pnand %p4954_p13, %p5401_p8  ;;  %p4963_p7 = por %p4962_p4, %p4961_p5 }
  0x28   : > { %p4957_p2 = pneg %p4956_p0 }
  0x2a   : > { %p4964_p9 = pnand %p4963_p7, %p4957_p2 }
  0x2c   : > { %4967 = shalt.err (!%p4964_p9)
}
  0x2d   : > { %s5253_s17 = smov 256   ;;  %s5254_s18 = smov 16  }
  0x2e   : > { %4518 = dma.hbm_to_vmem [thread:$0]  (!%p5385_p6), %s5973_s1, 16384, %s5374_s26, [#allocation6], %s5253_s17, %s5253_s17, %s5254_s18  }
  0x2f   : > { %s4968_s12 = scalar_lea.hbm %s5975_s3, 2048 }
  0x30   : > { %p4969_p4 = scmp.ne.s32.totalorder %s5975_s3, %s4968_s12  ;;  %p4975_p12 = scmp.lt.u32.totalorder %s4968_s12, %s5975_s3 }
  0x32   : > { %p4971_p10 = pnand %p4969_p4, %p5401_p8 }
  0x34   : > { %p4972_p11 = pneg %p4971_p10 }
  0x36   : > { %p4977_p13 = pnand %p4975_p12, %p4972_p11 }
  0x38   : > { %4980 = shalt.err (!%p4977_p13)
}
  0x39   : > { %s4981_s26 = scalar_lea.vmem %s5389_s30, 2048  ;;  %p4989_p7 = scmp.lt.s32.totalorder %s5389_s30, %s5389_s30 }
  0x3a   : > { %p4982_p0 = scmp.ne.s32.totalorder %s5389_s30, %s4981_s26  ;;  %p4990_p9 = scmp.lt.s32.totalorder %s4981_s26, %s4981_s26 }
  0x3c   : > { %p4984_p2 = pnand %p4982_p0, %p5401_p8  ;;  %p4991_p4 = por %p4990_p9, %p4989_p7 }
  0x3e   : > { %p4985_p5 = pneg %p4984_p2 }
  0x40   : > { %p4992_p10 = pnand %p4991_p4, %p4985_p5 }
  0x42   : > { %4995 = shalt.err (!%p4992_p10)
}
  0x43   : > { %s5255_s10 = smov 128   ;;  %s5256_s9 = smov 8  }
  0x44   : > { %4524 = dma.hbm_to_vmem [thread:$0]  (!%p5385_p6), %s5975_s3, 2048, %s5389_s30, [#allocation9], %s5255_s10, %s5255_s10, %s5256_s9  }
  0x45   : > { %s4996_s19 = scalar_lea.hbm %s5978_s6, 128 }
  0x46   : > { %p4997_p11 = scmp.ne.s32.totalorder %s5978_s6, %s4996_s19  ;;  %p5003_p0 = scmp.lt.u32.totalorder %s4996_s19, %s5978_s6 }
  0x48   : > { %p4999_p12 = pnand %p4997_p11, %p5401_p8 }
  0x4a   : > { %p5000_p13 = pneg %p4999_p12 }
  0x4c   : > { %p5005_p2 = pnand %p5003_p0, %p5000_p13 }
  0x4e   : > { %5008 = shalt.err (!%p5005_p2)
}
  0x4f   : > { %s5009_s26 = scalar_lea.vmem %s389_s15, 128  ;;  %p5017_p4 = scmp.lt.s32.totalorder %s389_s15, %s389_s15 }
  0x50   : > { %p5010_p5 = scmp.ne.s32.totalorder %s389_s15, %s5009_s26  ;;  %p5018_p10 = scmp.lt.s32.totalorder %s5009_s26, %s5009_s26 }
  0x52   : > { %p5012_p7 = pnand %p5010_p5, %p5401_p8  ;;  %p5019_p1 = por %p5018_p10, %p5017_p4 }
  0x54   : > { %p5013_p9 = pneg %p5012_p7 }
  0x56   : > { %p5020_p3 = pnand %p5019_p1, %p5013_p9 }
  0x58   : > { %5023 = shalt.err (!%p5020_p3)
}
  0x59   : > { %4530 = dma.hbm_to_vmem [thread:$0]  (!%p5385_p6), %s5978_s6, 128, %s389_s15, [#allocation12]  }
  0x5a   : > { %s5257_s9 = smov [#allocation7]   ;;  %s5024_s18 = scalar_lea.hbm %s5974_s2, 1024 }
  0x5b   : > { %s345_s11 = sshll.u32 %s5257_s9, 4  ;;  %p5025_p11 = scmp.ne.s32.totalorder %s5974_s2, %s5024_s18  ;;  %s346_s11 = int_to_ptr.vmem [resolvable:$true] %s345_s11 }
  0x5c   : > { %p5031_p12 = scmp.lt.u32.totalorder %s5024_s18, %s5974_s2 }
  0x5d   : > { %p5027_p1 = pnand %p5025_p11, %p5401_p8 }
  0x5f   : > { %p5028_p3 = pneg %p5027_p1 }
  0x61   : > { %p5033_p13 = pnand %p5031_p12, %p5028_p3 }
  0x63   : > { %5036 = shalt.err (!%p5033_p13)
}
  0x64   : > { %s5037_s15 = scalar_lea.vmem %s346_s11, 1024  ;;  %p5045_p7 = scmp.lt.s32.totalorder %s346_s11, %s346_s11 }
  0x65   : > { %p5038_p0 = scmp.ne.s32.totalorder %s346_s11, %s5037_s15  ;;  %p5046_p9 = scmp.lt.s32.totalorder %s5037_s15, %s5037_s15 }
  0x67   : > { %p5040_p2 = pnand %p5038_p0, %p5401_p8  ;;  %p5047_p4 = por %p5046_p9, %p5045_p7 }
  0x69   : > { %p5041_p5 = pneg %p5040_p2 }
  0x6b   : > { %p5048_p10 = pnand %p5047_p4, %p5041_p5 }
  0x6d   : > { %5051 = shalt.err (!%p5048_p10)
}
  0x6e   : > { %s5258_s16 = smov 64   ;;  %s5259_s26 = smov 4  }
  0x6f   : > { %4521 = dma.hbm_to_vmem [thread:$0]  (!%p5385_p6), %s5974_s2, 1024, %s346_s11, [#allocation6], %s5258_s16, %s5258_s16, %s5259_s26  }
  0x70   : > { %s5260_s9 = smov [#allocation10]   ;;  %s5261_s17 = smov [#allocation13]  }
  0x71   : > { %s371_s12 = sshll.u32 %s5260_s9, 4  ;;  %s398_s18 = sshll.u32 %s5261_s17, 4  ;;  %s372_s12 = int_to_ptr.vmem [resolvable:$true] %s371_s12  ;;  %s5485_s18 = int_to_ptr.vmem [resolvable:$true] %s398_s18 }
  0x72   : > { %s5052_s29 = scalar_lea.hbm %s5976_s4, 2048 }
  0x73   : > { %p5053_p11 = scmp.ne.s32.totalorder %s5976_s4, %s5052_s29  ;;  %p5059_p12 = scmp.lt.u32.totalorder %s5052_s29, %s5976_s4 }
  0x75   : > { %p5055_p1 = pnand %p5053_p11, %p5401_p8 }
  0x77   : > { %p5056_p3 = pneg %p5055_p1 }
  0x79   : > { %p5061_p13 = pnand %p5059_p12, %p5056_p3 }
  0x7b   : > { %5064 = shalt.err (!%p5061_p13)
}
  0x7c   : > { %s5065_s10 = scalar_lea.vmem %s372_s12, 2048  ;;  %p5073_p7 = scmp.lt.s32.totalorder %s372_s12, %s372_s12 }
  0x7d   : > { %p5066_p0 = scmp.ne.s32.totalorder %s372_s12, %s5065_s10  ;;  %p5074_p9 = scmp.lt.s32.totalorder %s5065_s10, %s5065_s10 }
  0x7f   : > { %p5068_p2 = pnand %p5066_p0, %p5401_p8  ;;  %p5075_p4 = por %p5074_p9, %p5073_p7 }
  0x81   : > { %p5069_p5 = pneg %p5068_p2 }
  0x83   : > { %p5076_p10 = pnand %p5075_p4, %p5069_p5 }
  0x85   : > { %5079 = shalt.err (!%p5076_p10)
}
  0x86   : > { %4527 = dma.hbm_to_vmem [thread:$0]  (!%p5385_p6), %s5976_s4, 2048, %s372_s12, [#allocation9], %s5258_s16, %s5258_s16, %s5259_s26  }
  0x87   : > { %s5080_s29 = scalar_lea.hbm %s5979_s7, 2048 }
  0x88   : > { %p5081_p11 = scmp.ne.s32.totalorder %s5979_s7, %s5080_s29  ;;  %p5087_p12 = scmp.lt.u32.totalorder %s5080_s29, %s5979_s7 }
  0x8a   : > { %p5083_p1 = pnand %p5081_p11, %p5401_p8 }
  0x8c   : > { %p5084_p3 = pneg %p5083_p1 }
  0x8e   : > { %p5089_p13 = pnand %p5087_p12, %p5084_p3 }
  0x90   : > { %5092 = shalt.err (!%p5089_p13)
}
  0x91   : > { %s5093_s12 = scalar_lea.vmem %s5485_s18, 2048  ;;  %p5101_p7 = scmp.lt.s32.totalorder %s5485_s18, %s5485_s18 }
  0x92   : > { %p5094_p0 = scmp.ne.s32.totalorder %s5485_s18, %s5093_s12  ;;  %p5102_p9 = scmp.lt.s32.totalorder %s5093_s12, %s5093_s12 }
  0x94   : > { %p5096_p2 = pnand %p5094_p0, %p5401_p8  ;;  %p5103_p4 = por %p5102_p9, %p5101_p7 }
  0x96   : > { %p5097_p5 = pneg %p5096_p2 }
  0x98   : > { %p5104_p10 = pnand %p5103_p4, %p5097_p5 }
  0x9a   : > { %5107 = shalt.err (!%p5104_p10)
}
  0x9b   : > { %4533 = dma.hbm_to_vmem [thread:$0]  (!%p5385_p6), %s5979_s7, 2048, %s5485_s18, [#allocation12], %s5258_s16, %s5258_s16, %s5259_s26  }
  0x9c   : > { %s5262_s17 = smov [#allocation14]   ;;  %s5108_s14 = scalar_lea.hbm %s5980_s8, 256 }
  0x9d   : > { %s411_s19 = sshll.u32 %s5262_s17, 4  ;;  %p5109_p11 = scmp.ne.s32.totalorder %s5980_s8, %s5108_s14  ;;  %s412_s19 = int_to_ptr.vmem [resolvable:$true] %s411_s19 }
  0x9e   : > { %p5115_p12 = scmp.lt.u32.totalorder %s5108_s14, %s5980_s8 }
  0x9f   : > { %p5111_p1 = pnand %p5109_p11, %p5401_p8 }
  0xa1   : > { %p5112_p3 = pneg %p5111_p1 }
  0xa3   : > { %p5117_p13 = pnand %p5115_p12, %p5112_p3 }
  0xa5   : > { %5120 = shalt.err (!%p5117_p13)
}
  0xa6   : > { %s5121_s18 = scalar_lea.vmem %s412_s19, 256  ;;  %p5129_p7 = scmp.lt.s32.totalorder %s412_s19, %s412_s19 }
  0xa7   : > { %p5122_p0 = scmp.ne.s32.totalorder %s412_s19, %s5121_s18  ;;  %p5130_p9 = scmp.lt.s32.totalorder %s5121_s18, %s5121_s18 }
  0xa9   : > { %p5124_p2 = pnand %p5122_p0, %p5401_p8  ;;  %p5131_p4 = por %p5130_p9, %p5129_p7 }
  0xab   : > { %p5125_p5 = pneg %p5124_p2 }
  0xad   : > { %p5132_p10 = pnand %p5131_p4, %p5125_p5 }
  0xaf   : > { %5135 = shalt.err (!%p5132_p10)
}
  0xb0   : > { %4536 = dma.hbm_to_vmem [thread:$0]  (!%p5385_p6), %s5980_s8, 256, %s412_s19, [#allocation15], %s5258_s16, %s5258_s16, %s5259_s26  }
  0xb1   : > { %s3966_s13 = sadd.s32 4294967294, %s5248_s24   ;;  %s5557_s25 = sadd.s32 1, %s5248_s24  }
  0xb2   : > { %s39_s17 = sadd.s32 1, %s5244_s23  ;;  %s36_s20 = ssub.s32 %s5248_s24, %s5557_s25 }
  0xb3   : > { %p46_p8 = scmp.ne.s32.totalorder %s5244_s23, %s5240_s22  ;;  %p37_p11 = scmp.eq.s32.totalorder %s36_s20, 0 }
  0xb4   : > { %p47_p1 = scmp.eq.s32.totalorder %s5248_s24, 0  ;;  %p52_p3 = scmp.ne.s32.totalorder %s5240_s22, %s5236_s21 }
  0xb5   : > { %p307_p12 = scmp.eq.s32.totalorder %s5369_s27, 1  ;;  %p5999_p0 = scmp.eq.s32.totalorder %s5369_s27, 0 }
  0xb6   : > { %s5569_s29 = scalar_select %p37_p11, %s5244_s23, %s39_s17  }
  0xb7   : > { %p48_p13 = por %p47_p1, %p46_p8  ;;  %p5573_p2 = por %p5999_p0, %p52_p3 }
  0xb8   : > { %p5577_p6 = por %p307_p12, %p46_p8  ;;  %p313_p5 = scmp.eq.s32.totalorder %s3966_s13, 1 }
  0xb9   : > { %p4552_p7 = scmp.lt.s32.totalorder %s5248_s24, 2  ;;  %s434_s26 = sand.u32 1, %s5244_s23  }
  0xba   : > { %s6001_s16 = scalar_select %p5577_p6, 1, 0 }
  0xbb   : > { %p5583_p9 = por %p313_p5, %p52_p3  ;;  %s3976_s15 = sshll.u32 %s434_s26, 5 }
  0xbc   : > { %s4221_s30 = sshll.u32 %s5248_s24, 9  ;;  %s6003_s0 = sld [smem:[#allocation23_spill]] }
  0xbd   : > { %s6002_s19 = scalar_select %p5583_p9, 1, 0 }
  0xbe   : > { %s438_s10 = scalar_lea.vmem [#allocation2], %s3976_s15  ;;  %p5593_p4 = pnand %p4552_p7, %p48_p13 }
  0xbf   : > { %s446_s9 = sshll.u32 %s438_s10, 4  ;;  %s435_s17 = scalar_lea.sflag [#allocation3], %s434_s26  ;;  %s5597_s9 = int_to_ptr.vmem [resolvable:$true] %s446_s9 }
  0xc0   : > { %p5138_p8 = pneg %p5593_p4 }
  0xc2   : > { %s5591_s18 = scalar_lea.hbm %s6003_s0, %s4221_s30  ;;  %s5141_s11 = scalar_lea.hbm %s6003_s0, 1024 }
  0xc3   : > { %s5136_s20 = scalar_lea.hbm %s5591_s18, 512  ;;  %p5142_p3 = scmp.lt.u32.totalorder %s5591_s18, %s6003_s0 }
  0xc4   : > { %p5137_p10 = scmp.ne.s32.totalorder %s5591_s18, %s5136_s20  ;;  %p5143_p12 = scmp.lt.u32.totalorder %s5141_s11, %s5136_s20 }
  0xc5   : > { %p5145_p0 = scmp.lt.u32.totalorder %s5136_s20, %s5591_s18 }
  0xc6   : > { %p5139_p11 = pnand %p5138_p8, %p5137_p10  ;;  %p5144_p13 = por %p5143_p12, %p5142_p3 }
  0xc8   : > { %p5140_p1 = pneg %p5139_p11  ;;  %p5146_p5 = por %p5145_p0, %p5144_p13 }
  0xca   : > { %p5147_p7 = pnand %p5146_p5, %p5140_p1 }
  0xcc   : > { %5150 = shalt.err (!%p5147_p7)
}
  0xcd   : > { %s5151_s26 = scalar_lea.vmem %s5597_s9, 512  ;;  %s5263_s30 = smov [#allocation2]  }
  0xce   : > { %p5152_p10 = scmp.ne.s32.totalorder %s5597_s9, %s5151_s26  ;;  %s5156_s15 = sshll.u32 %s5263_s30, 4  ;;  %s5157_s15 = int_to_ptr.vmem [resolvable:$false] %s5156_s15 }
  0xcf   : > { %s5158_s12 = scalar_lea.vmem %s5157_s15, 1024  ;;  %p5159_p6 = scmp.lt.s32.totalorder %s5597_s9, %s5157_s15 }
  0xd0   : > { %p5154_p11 = pnand %p5152_p10, %p5138_p8  ;;  %p5160_p3 = scmp.lt.s32.totalorder %s5158_s12, %s5151_s26 }
  0xd2   : > { %p5155_p9 = pneg %p5154_p11  ;;  %p5161_p12 = por %p5160_p3, %p5159_p6 }
  0xd4   : > { %p5162_p13 = pnand %p5161_p12, %p5155_p9 }
  0xd6   : > { %5165 = shalt.err (!%p5162_p13)
}
  0xd7   : > { %4540 = dma.hbm_to_vmem [thread:$0]  (!%p5593_p4), %s5591_s18, 512, %s5597_s9, %s435_s17  }
  0xd8   : > { %p6005_p1 = scmp.ne.s32.totalorder %s5996_s28, 0 }
  0xd9   : > { %s5627_s20 = sand.u32 (!%p6005_p1), 1, %s5240_s22  }
  0xda   : > { %455 = sbr.rel (%p6005_p1) target bundleno = 7151 (0x1bef), region = 68  ;;  %s3980_s11 = sshll.u32 (!%p6005_p1), %s5627_s20, 5 }
  0xdb   : > { %s458_s10 = scalar_lea.sflag (!%p6005_p1), [#allocation3], %s5627_s20  ;;  %s5631_s26 = scalar_lea.vmem (!%p6005_p1), [#allocation2], %s3980_s11 }
  0xe1   : > { %5211 = dma.done.wait (%p5573_p2), %s458_s10, 512  }
  0xe2   : > { %5213 = vsyncadd (%p5573_p2), %s458_s10, 4294966784  ;;  %p6006_p6 = scmp.eq.s32.totalorder %s5369_s27, 0 }
  0xe4   : > { %5215 = dma.done.wait (%p6006_p6), [#allocation6], 17408   ;;  %p6007_p9 = pmov %p6006_p6 }
  0xe5   : > { %p6008_p4 = pmov %p6006_p6 }
  0xe6   : > { %5217 = vsyncadd (%p6007_p9), [#allocation6], 4294949888 }
  0xe7   : > { %5219 = dma.done.wait (%p6008_p4), [#allocation9], 4096   ;;  %p6009_p8 = pmov %p6008_p4 }
  0xe8   : > { %p6010_p0 = pmov %p6008_p4 }
  0xe9   : > { %5221 = vsyncadd (%p6009_p8), [#allocation9], 4294963200 }
  0xea   : > { %5223 = dma.done.wait (%p6010_p0), [#allocation12], 2176   ;;  %p6011_p5 = pmov %p6010_p0 }
  0xeb   : > { %p6012_p2 = pmov %p6010_p0 }
  0xec   : > { %5225 = vsyncadd (%p6011_p5), [#allocation12], 4294965120 }
  0xed   : > { %5227 = dma.done.wait (%p6012_p2), [#allocation15], 256   ;;  %p6013_p7 = pmov %p6010_p0 }
  0xee   : > { %v4624_v0 = vld [vmem:[#allocation5 + $0x4] ss:$16 sps:$4 sm:$0xff]   ;;  %v4626_v1 = vld [vmem:[#allocation5] ss:$16 sps:$4 sm:$0xff]   ;;  %v532_v13 = vld [vmem:[%s5631_s26 + $0x8] sm:$0xff]  ;;  %vm5265_vm0 = vmmov 0  }
  0xef   : > { %5229 = vsyncadd (%p6013_p7), [#allocation15], 4294967040  ;;  %1309 = vmatprep.subr.bf16.mxu0 %v4624_v0  ;;  %v4627_v2 = vld [vmem:[#allocation5 + $0x24] ss:$16 sps:$4 sm:$0xff]   ;;  %v4629_v3 = vld [vmem:[#allocation5 + $0x20] ss:$16 sps:$4 sm:$0xff]   ;;  %v538_v14 = vpack.c.bf16 %v532_v13, %v532_v13 }
  0xf0   : > { %1310 = vmatpush1.bf16.msra.mxu0 %v4626_v1  ;;  %v4630_v4 = vld [vmem:[#allocation5 + $0x44] ss:$16 sps:$4 sm:$0xff]   ;;  %v4632_v5 = vld [vmem:[#allocation5 + $0x40] ss:$16 sps:$4 sm:$0xff]   ;;  %v4720_v27 = vld [vmem:[#allocation5 + $0xc] ss:$16 sps:$4 sm:$0xff]  }
  0xf1   : > { %1311 = vmatprep.subr.bf16.mxu0 %v4627_v2  ;;  %v4633_v6 = vld [vmem:[#allocation5 + $0x64] ss:$16 sps:$4 sm:$0xff]   ;;  %v4635_v7 = vld [vmem:[#allocation5 + $0x60] ss:$16 sps:$4 sm:$0xff]   ;;  %1341 = vmatprep.mubr.bf16.mxu0 %v538_v14  ;;  %v4722_v28 = vld [vmem:[#allocation5 + $0x8] ss:$16 sps:$4 sm:$0xff]  }
  0xf2   : > { %v4636_v8 = vld [vmem:[#allocation5 + $0x84] ss:$16 sps:$4 sm:$0xff]   ;;  %v4638_v9 = vld [vmem:[#allocation5 + $0x80] ss:$16 sps:$4 sm:$0xff]   ;;  %1423 = vmatprep.mubr.bf16.mxu1 %v538_v14  ;;  %1391 = vmatprep.subr.bf16.mxu1 %v4720_v27  ;;  %v4723_v30 = vld [vmem:[#allocation5 + $0x2c] ss:$16 sps:$4 sm:$0xff]  }
  0xf3   : > { %v4639_v10 = vld [vmem:[#allocation5 + $0xa4] ss:$16 sps:$4 sm:$0xff]   ;;  %v4641_v11 = vld [vmem:[#allocation5 + $0xa0] ss:$16 sps:$4 sm:$0xff]   ;;  %1392 = vmatpush1.bf16.msra.mxu1 %v4722_v28  ;;  %v4725_v32 = vld [vmem:[#allocation5 + $0x28] ss:$16 sps:$4 sm:$0xff]  }
  0xf4   : > { %1312 = vmatpush1.bf16.msra.mxu0 %v4629_v3  ;;  %v4642_v12 = vld [vmem:[#allocation5 + $0xc4] ss:$16 sps:$4 sm:$0xff]   ;;  %v4644_v15 = vld [vmem:[#allocation5 + $0xc0] ss:$16 sps:$4 sm:$0xff]   ;;  %1393 = vmatprep.subr.bf16.mxu1 %v4723_v30  ;;  %v4726_v33 = vld [vmem:[#allocation5 + $0x4c] ss:$16 sps:$4 sm:$0xff]  }
  0xf5   : > { %1313 = vmatprep.subr.bf16.mxu0 %v4630_v4  ;;  %v4645_v16 = vld [vmem:[#allocation5 + $0xe4] ss:$16 sps:$4 sm:$0xff]   ;;  %v4647_v17 = vld [vmem:[#allocation5 + $0xe0] ss:$16 sps:$4 sm:$0xff]   ;;  %v4728_v36 = vld [vmem:[#allocation5 + $0x48] ss:$16 sps:$4 sm:$0xff]  }
  0xf6   : > { %v4648_v18 = vld [vmem:[#allocation5 + $0x104] ss:$16 sps:$4 sm:$0xff]   ;;  %v4650_v19 = vld [vmem:[#allocation5 + $0x100] ss:$16 sps:$4 sm:$0xff]   ;;  %v4729_v37 = vld [vmem:[#allocation5 + $0x6c] ss:$16 sps:$4 sm:$0xff]  }
  0xf7   : > { %v4651_v20 = vld [vmem:[#allocation5 + $0x124] ss:$16 sps:$4 sm:$0xff]   ;;  %v4653_v21 = vld [vmem:[#allocation5 + $0x120] ss:$16 sps:$4 sm:$0xff]   ;;  %1394 = vmatpush1.bf16.msra.mxu1 %v4725_v32  ;;  %v4731_v40 = vld [vmem:[#allocation5 + $0x68] ss:$16 sps:$4 sm:$0xff]  }
  0xf8   : > { %1314 = vmatpush1.bf16.msra.mxu0 %v4632_v5  ;;  %v4654_v22 = vld [vmem:[#allocation5 + $0x144] ss:$16 sps:$4 sm:$0xff]   ;;  %v4656_v23 = vld [vmem:[#allocation5 + $0x140] ss:$16 sps:$4 sm:$0xff]   ;;  %1395 = vmatprep.subr.bf16.mxu1 %v4726_v33  ;;  %v4732_v41 = vld [vmem:[#allocation5 + $0x8c] ss:$16 sps:$4 sm:$0xff]  }
  0xf9   : > { %1315 = vmatprep.subr.bf16.mxu0 %v4633_v6  ;;  %v4657_v24 = vld [vmem:[#allocation5 + $0x164] ss:$16 sps:$4 sm:$0xff]   ;;  %v4659_v25 = vld [vmem:[#allocation5 + $0x160] ss:$16 sps:$4 sm:$0xff]   ;;  %v534_v45 = vld [vmem:[%s5631_s26 + $0x18] sm:$0xff]  ;;  %vm1489_vm1 = vcmask 261120  }
  0xfa   : > { %v4660_v26 = vld [vmem:[#allocation5 + $0x184] ss:$16 sps:$4 sm:$0xff]   ;;  %v4662_v29 = vld [vmem:[#allocation5 + $0x180] ss:$16 sps:$4 sm:$0xff]   ;;  %v4734_v46 = vld [vmem:[#allocation5 + $0x88] ss:$16 sps:$4 sm:$0xff]   ;;  %v5658_v51 = vpack.c.bf16 %v534_v45, %v534_v45 }
  0xfb   : > { %v4663_v31 = vld [vmem:[#allocation5 + $0x1a4] ss:$16 sps:$4 sm:$0xff]   ;;  %v4665_v34 = vld [vmem:[#allocation5 + $0x1a0] ss:$16 sps:$4 sm:$0xff]   ;;  %1396 = vmatpush1.bf16.msra.mxu1 %v4728_v36  ;;  %v4735_v47 = vld [vmem:[#allocation5 + $0xac] ss:$16 sps:$4 sm:$0xff]  }
  0xfc   : > { %1316 = vmatpush1.bf16.msra.mxu0 %v4635_v7  ;;  %v4666_v35 = vld [vmem:[#allocation5 + $0x1c4] ss:$16 sps:$4 sm:$0xff]   ;;  %v4668_v38 = vld [vmem:[#allocation5 + $0x1c0] ss:$16 sps:$4 sm:$0xff]   ;;  %1397 = vmatprep.subr.bf16.mxu1 %v4729_v37  ;;  %v4737_v52 = vld [vmem:[#allocation5 + $0xa8] ss:$16 sps:$4 sm:$0xff]  }
  0xfd   : > { %1317 = vmatprep.subr.bf16.mxu0 %v4636_v8  ;;  %v4669_v39 = vld [vmem:[#allocation5 + $0x1e4] ss:$16 sps:$4 sm:$0xff]   ;;  %v4671_v42 = vld [vmem:[#allocation5 + $0x1e0] ss:$16 sps:$4 sm:$0xff]   ;;  %v4738_v53 = vld [vmem:[#allocation5 + $0xcc] ss:$16 sps:$4 sm:$0xff]  }
  0xfe   : > { %v4674_v43 = vld [vmem:[#allocation5 + $0x204] ss:$16 sps:$4 sm:$0xff]   ;;  %v4672_v49 = vld [vmem:[#allocation5 + $0x200] ss:$16 sps:$4 sm:$0xff]   ;;  %v4740_v56 = vld [vmem:[#allocation5 + $0xc8] ss:$16 sps:$4 sm:$0xff]  }
  0xff   : > { %v531_v44 = vld [vmem:[%s5631_s26] sm:$0xff]  ;;  %1398 = vmatpush1.bf16.msra.mxu1 %v4731_v40  ;;  %v4741_v57 = vld [vmem:[#allocation5 + $0xec] ss:$16 sps:$4 sm:$0xff]   ;;  %v4743_v60 = vld [vmem:[#allocation5 + $0xe8] ss:$16 sps:$4 sm:$0xff]   ;;  %s5266_s28 = smov 64  }
 0x100   : > { %1318 = vmatpush1.bf16.msra.mxu0 %v4638_v9  ;;  %1399 = vmatprep.subr.bf16.mxu1 %v4732_v41  ;;  %v5656_v48 = vpack.c.bf16 %v531_v44, %v531_v44  ;;  %v4677_v50 = vld [vmem:[#allocation5 + $0x224] ss:$16 sps:$4 sm:$0xff]   ;;  %v4675_v54 = vld [vmem:[#allocation5 + $0x220] ss:$16 sps:$4 sm:$0xff]   ;;  %v4744_v61 = vld [vmem:[#allocation5 + $0x10c] ss:$16 sps:$4 sm:$0xff]  }
 0x101   : > { %1319 = vmatprep.subr.bf16.mxu0 %v4639_v10  ;;  %v4680_v55 = vld [vmem:[#allocation5 + $0x244] ss:$16 sps:$4 sm:$0xff]   ;;  %v4678_v58 = vld [vmem:[#allocation5 + $0x240] ss:$16 sps:$4 sm:$0xff]   ;;  %v4746_v0 = vld [vmem:[#allocation5 + $0x108] ss:$16 sps:$4 sm:$0xff]  }
 0x102   : > { %v4683_v59 = vld [vmem:[#allocation5 + $0x264] ss:$16 sps:$4 sm:$0xff]   ;;  %v4681_v62 = vld [vmem:[#allocation5 + $0x260] ss:$16 sps:$4 sm:$0xff]   ;;  %v4747_v1 = vld [vmem:[#allocation5 + $0x12c] ss:$16 sps:$4 sm:$0xff]  }
 0x103   : > { %1400 = vmatpush1.bf16.msra.mxu1 %v4734_v46  ;;  %v4686_v63 = vld [vmem:[#allocation5 + $0x284] ss:$16 sps:$4 sm:$0xff]   ;;  %v4684_v2 = vld [vmem:[#allocation5 + $0x280] ss:$16 sps:$4 sm:$0xff]   ;;  %v4749_v4 = vld [vmem:[#allocation5 + $0x128] ss:$16 sps:$4 sm:$0xff]  }
 0x104   : > { %1320 = vmatpush1.bf16.msra.mxu0 %v4641_v11  ;;  %1401 = vmatprep.subr.bf16.mxu1 %v4735_v47  ;;  %v4689_v3 = vld [vmem:[#allocation5 + $0x2a4] ss:$16 sps:$4 sm:$0xff]   ;;  %v4750_v5 = vld [vmem:[#allocation5 + $0x14c] ss:$16 sps:$4 sm:$0xff]   ;;  %v4687_v6 = vld [vmem:[#allocation5 + $0x2a0] ss:$16 sps:$4 sm:$0xff]  }
 0x105   : > { %1321 = vmatprep.subr.bf16.mxu0 %v4642_v12  ;;  %v4692_v7 = vld [vmem:[#allocation5 + $0x2c4] ss:$16 sps:$4 sm:$0xff]   ;;  %v4752_v8 = vld [vmem:[#allocation5 + $0x148] ss:$16 sps:$4 sm:$0xff]   ;;  %v4690_v9 = vld [vmem:[#allocation5 + $0x2c0] ss:$16 sps:$4 sm:$0xff]  }
 0x106   : > { %v4753_v10 = vld [vmem:[#allocation5 + $0x16c] ss:$16 sps:$4 sm:$0xff]   ;;  %v4695_v11 = vld [vmem:[#allocation5 + $0x2e4] ss:$16 sps:$4 sm:$0xff]   ;;  %v4755_v12 = vld [vmem:[#allocation5 + $0x168] ss:$16 sps:$4 sm:$0xff]  }
 0x107   : > { %1402 = vmatpush1.bf16.msra.mxu1 %v4737_v52  ;;  %v4756_v13 = vld [vmem:[#allocation5 + $0x18c] ss:$16 sps:$4 sm:$0xff]   ;;  %v4693_v14 = vld [vmem:[#allocation5 + $0x2e0] ss:$16 sps:$4 sm:$0xff]   ;;  %v4707_v27 = vld [vmem:[#allocation5 + $0x364] ss:$16 sps:$4 sm:$0xff]  }
 0x108   : > { %1322 = vmatpush1.bf16.msra.mxu0 %v4644_v15  ;;  %1403 = vmatprep.subr.bf16.mxu1 %v4738_v53  ;;  %v4698_v15 = vld [vmem:[#allocation5 + $0x304] ss:$16 sps:$4 sm:$0xff]   ;;  %v4767_v28 = vld [vmem:[#allocation5 + $0x1e8] ss:$16 sps:$4 sm:$0xff]   ;;  %v4705_v30 = vld [vmem:[#allocation5 + $0x360] ss:$16 sps:$4 sm:$0xff]  }
 0x109   : > { %1323 = vmatprep.subr.bf16.mxu0 %v4645_v16  ;;  %v4758_v16 = vld [vmem:[#allocation5 + $0x188] ss:$16 sps:$4 sm:$0xff]   ;;  %v4773_v33 = vld [vmem:[#allocation5 + $0x22c] ss:$16 sps:$4 sm:$0xff]   ;;  %v4717_v46 = vld [vmem:[#allocation5 + $0x3e0] ss:$16 sps:$4 sm:$0xff]  }
 0x10a   : > { %v4768_v32 = vld [vmem:[#allocation5 + $0x208] ss:$16 sps:$4 sm:$0xff]   ;;  %v4776_v37 = vld [vmem:[#allocation5 + $0x24c] ss:$16 sps:$4 sm:$0xff]   ;;  %v533_v47 = vld [vmem:[%s5631_s26 + $0x10] sm:$0xff]  ;;  %s5267_s14 = smov 96  }
 0x10b   : > { %1404 = vmatpush1.bf16.msra.mxu1 %v4740_v56  ;;  %v4771_v36 = vld [vmem:[#allocation5 + $0x228] ss:$16 sps:$4 sm:$0xff]   ;;  %v4779_v41 = vld [vmem:[#allocation5 + $0x26c] ss:$16 sps:$4 sm:$0xff]   ;;  %s5268_s18 = smov 32   ;;  %vm1566_vm2 = vcmask 64512  }
 0x10c   : > { %1324 = vmatpush1.bf16.msra.mxu0 %v4647_v17  ;;  %1405 = vmatprep.subr.bf16.mxu1 %v4741_v57  ;;  %v4759_v17 = vld [vmem:[#allocation5 + $0x1ac] ss:$16 sps:$4 sm:$0xff]   ;;  %v4774_v40 = vld [vmem:[#allocation5 + $0x248] ss:$16 sps:$4 sm:$0xff]   ;;  %vm2160_vm3 = vcmask 523264   ;;  %vm2162_vm4 = vcmask 785408  }
 0x10d   : > { %1325 = vmatprep.subr.bf16.mxu0 %v4648_v18  ;;  %v4696_v18 = vld [vmem:[#allocation5 + $0x300] ss:$16 sps:$4 sm:$0xff]   ;;  %v4777_v44 = vld [vmem:[#allocation5 + $0x268] ss:$16 sps:$4 sm:$0xff]   ;;  %v4782_v45 = vld [vmem:[#allocation5 + $0x28c] ss:$16 sps:$4 sm:$0xff]  }
 0x10e   : > { %v4788_v52 = vld [vmem:[#allocation5 + $0x2cc] ss:$16 sps:$4 sm:$0xff]   ;;  %v4786_v53 = vld [vmem:[#allocation5 + $0x2c8] ss:$16 sps:$4 sm:$0xff]   ;;  %s5270_s11 = smov 88   ;;  %s5271_s10 = smov 120  }
 0x10f   : > { %1406 = vmatpush1.bf16.msra.mxu1 %v4743_v60  ;;  %v4794_v56 = vld [vmem:[#allocation5 + $0x30c] ss:$16 sps:$4 sm:$0xff]   ;;  %v4792_v57 = vld [vmem:[#allocation5 + $0x308] ss:$16 sps:$4 sm:$0xff]   ;;  %s5274_s26 = smov 80   ;;  %s5276_s9 = smov 104  }
 0x110   : > { %1326 = vmatpush1.bf16.msra.mxu0 %v4650_v19  ;;  %1407 = vmatprep.subr.bf16.mxu1 %v4744_v61  ;;  %v4701_v19 = vld [vmem:[#allocation5 + $0x324] ss:$16 sps:$4 sm:$0xff]   ;;  %v4800_v60 = vld [vmem:[#allocation5 + $0x34c] ss:$16 sps:$4 sm:$0xff]   ;;  %v4798_v61 = vld [vmem:[#allocation5 + $0x348] ss:$16 sps:$4 sm:$0xff]  }
 0x111   : > { %1327 = vmatprep.subr.bf16.mxu0 %v4651_v20  ;;  %v4761_v20 = vld [vmem:[#allocation5 + $0x1a8] ss:$16 sps:$4 sm:$0xff]   ;;  %s5277_s13 = smov 48   ;;  %s5278_s17 = smov 40   ;;  %vm3569_vm5 = vcmask 130048   ;;  %vm3571_vm6 = vcmask 195584  }
 0x112   : > { %s5279_s30 = smov 16   ;;  %s5280_s15 = smov 8  }
 0x113   : > { %1408 = vmatpush1.bf16.msra.mxu1 %v4746_v0  ;;  %v4806_v0 = vld [vmem:[#allocation5 + $0x38c] ss:$16 sps:$4 sm:$0xff]   ;;  %s5281_s12 = smov 24   ;;  %p6018_p11 = scmp.ne.s32.totalorder %s6001_s16, 0 }
 0x114   : > { %1328 = vmatpush1.bf16.msra.mxu0 %v4653_v21  ;;  %1409 = vmatprep.subr.bf16.mxu1 %v4747_v1  ;;  %v4762_v21 = vld [vmem:[#allocation5 + $0x1cc] ss:$16 sps:$4 sm:$0xff]   ;;  %v4804_v1 = vld [vmem:[#allocation5 + $0x388] ss:$16 sps:$4 sm:$0xff]  }
 0x115   : > { %1329 = vmatprep.subr.bf16.mxu0 %v4654_v22  ;;  %v4699_v22 = vld [vmem:[#allocation5 + $0x320] ss:$16 sps:$4 sm:$0xff]  }
 0x117   : > { %1410 = vmatpush1.bf16.msra.mxu1 %v4749_v4  ;;  %v4812_v4 = vld [vmem:[#allocation5 + $0x3cc] ss:$16 sps:$4 sm:$0xff]  }
 0x118   : > { %1330 = vmatpush1.bf16.msra.mxu0 %v4656_v23  ;;  %1411 = vmatprep.subr.bf16.mxu1 %v4750_v5  ;;  %v4704_v23 = vld [vmem:[#allocation5 + $0x344] ss:$16 sps:$4 sm:$0xff]   ;;  %v4810_v5 = vld [vmem:[#allocation5 + $0x3c8] ss:$16 sps:$4 sm:$0xff]  }
 0x119   : > { %1331 = vmatprep.subr.bf16.mxu0 %v4657_v24  ;;  %v4764_v24 = vld [vmem:[#allocation5 + $0x1c8] ss:$16 sps:$4 sm:$0xff]  }
 0x11b   : > { %1412 = vmatpush1.bf16.msra.mxu1 %v4752_v8  ;;  %v5264_v8 = vmov 0.0  }
 0x11c   : > { %1332 = vmatpush1.bf16.msra.mxu0 %v4659_v25  ;;  %1413 = vmatprep.subr.bf16.mxu1 %v4753_v10  ;;  %v4765_v25 = vld [vmem:[#allocation5 + $0x1ec] ss:$16 sps:$4 sm:$0xff]  }
 0x11d   : > { %1333 = vmatprep.subr.bf16.mxu0 %v4660_v26  ;;  %v4702_v26 = vld [vmem:[#allocation5 + $0x340] ss:$16 sps:$4 sm:$0xff]  }
 0x11f   : > { %1414 = vmatpush1.bf16.msra.mxu1 %v4755_v12 }
 0x120   : > { %1334 = vmatpush1.bf16.msra.mxu0 %v4662_v29  ;;  %1415 = vmatprep.subr.bf16.mxu1 %v4756_v13  ;;  %v4770_v29 = vld [vmem:[#allocation5 + $0x20c] ss:$16 sps:$4 sm:$0xff]  }
 0x121   : > { %1335 = vmatprep.subr.bf16.mxu0 %v4663_v31  ;;  %v4710_v31 = vld [vmem:[#allocation5 + $0x384] ss:$16 sps:$4 sm:$0xff]  }
 0x123   : > { %1416 = vmatpush1.bf16.msra.mxu1 %v4758_v16 }
 0x124   : > { %1336 = vmatpush1.bf16.msra.mxu0 %v4665_v34  ;;  %1417 = vmatprep.subr.bf16.mxu1 %v4759_v17  ;;  %v4708_v34 = vld [vmem:[#allocation5 + $0x380] ss:$16 sps:$4 sm:$0xff]  }
 0x125   : > { %1337 = vmatprep.subr.bf16.mxu0 %v4666_v35  ;;  %v4713_v35 = vld [vmem:[#allocation5 + $0x3a4] ss:$16 sps:$4 sm:$0xff]  }
 0x127   : > { %1418 = vmatpush1.bf16.msra.mxu1 %v4761_v20 }
 0x128   : > { %1338 = vmatpush1.bf16.msra.mxu0 %v4668_v38  ;;  %1419 = vmatprep.subr.bf16.mxu1 %v4762_v21  ;;  %v4711_v38 = vld [vmem:[#allocation5 + $0x3a0] ss:$16 sps:$4 sm:$0xff]  }
 0x129   : > { %1339 = vmatprep.subr.bf16.mxu0 %v4669_v39  ;;  %v4716_v39 = vld [vmem:[#allocation5 + $0x3c4] ss:$16 sps:$4 sm:$0xff]  }
 0x12b   : > { %1420 = vmatpush1.bf16.msra.mxu1 %v4764_v24 }
 0x12c   : > { %1340 = vmatpush1.bf16.msra.mxu0 %v4671_v42  ;;  %1421 = vmatprep.subr.bf16.mxu1 %v4765_v25  ;;  %v4714_v42 = vld [vmem:[#allocation5 + $0x3c0] ss:$16 sps:$4 sm:$0xff]  }
 0x12d   : > { %1350 = vmatprep.subr.bf16.mxu0 %v4674_v43  ;;  %v4719_v43 = vld [vmem:[#allocation5 + $0x3e4] ss:$16 sps:$4 sm:$0xff]  }
 0x12f   : > { %1342 = vmatmul.mubr.bf16.vlgmr.msra.gmra.mrb[0].mxu0 %v5656_v48  ;;  %1422 = vmatpush1.bf16.msra.mxu1 %v4767_v28 }
 0x130   : > { %1351 = vmatpush1.bf16.msra.mxu0 %v4672_v49  ;;  %1382 = vmatprep.mubr.bf16.mxu0 %v5658_v51  ;;  %v4785_v49 = vld [vmem:[#allocation5 + $0x2ac] ss:$16 sps:$4 sm:$0xff]  }
 0x131   : > { %1352 = vmatprep.subr.bf16.mxu0 %v4677_v50  ;;  %1432 = vmatprep.subr.bf16.mxu1 %v4770_v29  ;;  %v539_v50 = vpack.c.bf16 %v533_v47, %v533_v47 }
 0x132   : > { %1424 = vmatmul.mubr.bf16.vlgmr.msra.gmra.mrb[0].mxu1 %v5656_v48  ;;  %v4780_v48 = vld [vmem:[#allocation5 + $0x288] ss:$16 sps:$4 sm:$0xff]  }
 0x133   : > { %1433 = vmatpush1.bf16.msra.mxu1 %v4768_v32  ;;  %1464 = vmatprep.mubr.bf16.mxu1 %v5658_v51  ;;  %v4783_v51 = vld [vmem:[#allocation5 + $0x2a8] ss:$16 sps:$4 sm:$0xff]  }
 0x134   : > { %1353 = vmatpush1.bf16.msra.mxu0 %v4675_v54  ;;  %1434 = vmatprep.subr.bf16.mxu1 %v4773_v33  ;;  %v4791_v54 = vld [vmem:[#allocation5 + $0x2ec] ss:$16 sps:$4 sm:$0xff]  }
 0x135   : > { %1354 = vmatprep.subr.bf16.mxu0 %v4680_v55  ;;  %v4789_v55 = vld [vmem:[#allocation5 + $0x2e8] ss:$16 sps:$4 sm:$0xff]  }
 0x137   : > { %1435 = vmatpush1.bf16.msra.mxu1 %v4771_v36 }
 0x138   : > { %1355 = vmatpush1.bf16.msra.mxu0 %v4678_v58  ;;  %1436 = vmatprep.subr.bf16.mxu1 %v4776_v37  ;;  %v4797_v58 = vld [vmem:[#allocation5 + $0x32c] ss:$16 sps:$4 sm:$0xff]  }
 0x139   : > { %1356 = vmatprep.subr.bf16.mxu0 %v4683_v59  ;;  %v4795_v59 = vld [vmem:[#allocation5 + $0x328] ss:$16 sps:$4 sm:$0xff]  }
 0x13b   : > { %1437 = vmatpush1.bf16.msra.mxu1 %v4774_v40 }
 0x13c   : > { %1357 = vmatpush1.bf16.msra.mxu0 %v4681_v62  ;;  %1438 = vmatprep.subr.bf16.mxu1 %v4779_v41  ;;  %v4803_v62 = vld [vmem:[#allocation5 + $0x36c] ss:$16 sps:$4 sm:$0xff]  }
 0x13d   : > { %1358 = vmatprep.subr.bf16.mxu0 %v4686_v63  ;;  %v4801_v63 = vld [vmem:[#allocation5 + $0x368] ss:$16 sps:$4 sm:$0xff]  }
 0x13f   : > { %1439 = vmatpush1.bf16.msra.mxu1 %v4777_v44 }
 0x140   : > { %1359 = vmatpush1.bf16.msra.mxu0 %v4684_v2  ;;  %1440 = vmatprep.subr.bf16.mxu1 %v4782_v45  ;;  %v4809_v2 = vld [vmem:[#allocation5 + $0x3ac] ss:$16 sps:$4 sm:$0xff]  }
 0x141   : > { %1360 = vmatprep.subr.bf16.mxu0 %v4689_v3  ;;  %v4807_v3 = vld [vmem:[#allocation5 + $0x3a8] ss:$16 sps:$4 sm:$0xff]  }
 0x143   : > { %1441 = vmatpush1.bf16.msra.mxu1 %v4780_v48 }
 0x144   : > { %1361 = vmatpush1.bf16.msra.mxu0 %v4687_v6  ;;  %1442 = vmatprep.subr.bf16.mxu1 %v4785_v49  ;;  %v4815_v6 = vld [vmem:[#allocation5 + $0x3ec] ss:$16 sps:$4 sm:$0xff]  }
 0x145   : > { %1362 = vmatprep.subr.bf16.mxu0 %v4692_v7  ;;  %v4813_v7 = vld [vmem:[#allocation5 + $0x3e8] ss:$16 sps:$4 sm:$0xff]  }
 0x147   : > { %1443 = vmatpush1.bf16.msra.mxu1 %v4783_v51 }
 0x148   : > { %1363 = vmatpush1.bf16.msra.mxu0 %v4690_v9  ;;  %1444 = vmatprep.subr.bf16.mxu1 %v4788_v52 }
 0x149   : > { %1364 = vmatprep.subr.bf16.mxu0 %v4695_v11 }
 0x14b   : > { %1445 = vmatpush1.bf16.msra.mxu1 %v4786_v53 }
 0x14c   : > { %1365 = vmatpush1.bf16.msra.mxu0 %v4693_v14  ;;  %1446 = vmatprep.subr.bf16.mxu1 %v4791_v54 }
 0x14d   : > { %1366 = vmatprep.subr.bf16.mxu0 %v4698_v15 }
 0x14f   : > { %1447 = vmatpush1.bf16.msra.mxu1 %v4789_v55 }
 0x150   : > { %1367 = vmatpush1.bf16.msra.mxu0 %v4696_v18  ;;  %1448 = vmatprep.subr.bf16.mxu1 %v4794_v56 }
 0x151   : > { %1368 = vmatprep.subr.bf16.mxu0 %v4701_v19 }
 0x153   : > { %1449 = vmatpush1.bf16.msra.mxu1 %v4792_v57 }
 0x154   : > { %1369 = vmatpush1.bf16.msra.mxu0 %v4699_v22  ;;  %1450 = vmatprep.subr.bf16.mxu1 %v4797_v58 }
 0x155   : > { %1370 = vmatprep.subr.bf16.mxu0 %v4704_v23 }
 0x157   : > { %1451 = vmatpush1.bf16.msra.mxu1 %v4795_v59 }
 0x158   : > { %1371 = vmatpush1.bf16.msra.mxu0 %v4702_v26  ;;  %1452 = vmatprep.subr.bf16.mxu1 %v4800_v60 }
 0x159   : > { %1372 = vmatprep.subr.bf16.mxu0 %v4707_v27 }
 0x15b   : > { %1453 = vmatpush1.bf16.msra.mxu1 %v4798_v61 }
 0x15c   : > { %1373 = vmatpush1.bf16.msra.mxu0 %v4705_v30  ;;  %1454 = vmatprep.subr.bf16.mxu1 %v4803_v62 }
 0x15d   : > { %1374 = vmatprep.subr.bf16.mxu0 %v4710_v31 }
 0x15f   : > { %1455 = vmatpush1.bf16.msra.mxu1 %v4801_v63 }
 0x160   : > { %1375 = vmatpush1.bf16.msra.mxu0 %v4708_v34  ;;  %1456 = vmatprep.subr.bf16.mxu1 %v4806_v0 }
 0x161   : > { %1376 = vmatprep.subr.bf16.mxu0 %v4713_v35 }
 0x163   : > { %1457 = vmatpush1.bf16.msra.mxu1 %v4804_v1 }
 0x164   : > { %1377 = vmatpush1.bf16.msra.mxu0 %v4711_v38  ;;  %1458 = vmatprep.subr.bf16.mxu1 %v4809_v2 }
 0x165   : > { %1378 = vmatprep.subr.bf16.mxu0 %v4716_v39 }
 0x167   : > { %1459 = vmatpush1.bf16.msra.mxu1 %v4807_v3 }
 0x168   : > { %1379 = vmatpush1.bf16.msra.mxu0 %v4714_v42  ;;  %1460 = vmatprep.subr.bf16.mxu1 %v4812_v4 }
 0x169   : > { %1380 = vmatprep.subr.bf16.mxu0 %v4719_v43 }
 0x16b   : > { %1461 = vmatpush1.bf16.msra.mxu1 %v4810_v5 }
 0x16c   : > { %1381 = vmatpush1.bf16.msra.mxu0 %v4717_v46  ;;  %1462 = vmatprep.subr.bf16.mxu1 %v4815_v6  ;;  %v4816_v6 = vld [vmem:[#allocation7] sm:$0xff]  }
 0x16d   : > { %4337 = vmatprep.subr.mxu0 %v5264_v8 }
 0x16f   : > { %1383 = vmatmul.mubr.bf16.vlgmr.msra.gmra.mrb[0].mxu0 %v539_v50  ;;  %1463 = vmatpush1.bf16.msra.mxu1 %v4813_v7  ;;  %v4817_v7 = vld [vmem:[#allocation7 + $0x8] sm:$0xff]  }
 0x170   : > { %4327 = vmatprep.subr.mxu1 %v5264_v8  ;;  %4339 = vmatprep.mubr.msk.f32.mxu0 %vm5265_vm0, %v5264_v8 }
 0x172   : > { %1465 = vmatmul.mubr.bf16.vlgmr.msra.gmra.mrb[0].mxu1 %v539_v50 }
 0x173   : > { %4329 = vmatprep.mubr.msk.f32.mxu1 %vm5265_vm0, %v5264_v8 }
 0x242   : > { %v1384_v9 = vpop.f32.mrb[0].mxu0 }
 0x243   : > { %v1386_v10 = vpop.f32.mrb[1].mxu0 }
 0x244   : > { %1819 = vrot.lane.b32.xlu1 %v1386_v10, %s5266_s28  ;;  %1653 = vrot.lane.b32.xlu0 %v1386_v10, %s5267_s14  ;;  %v1388_v11 = vpop.f32.mrb[2].mxu0 }
 0x245   : > { %4328 = vmatpush3.xpose.msk.msra.mxu1 %vm1489_vm1, %v1386_v10  ;;  %v1389_v12 = vpop.f32.mrb[3].mxu0  ;;  %v5682_v13 = vpop.f32.mrb[0].mxu1 }
 0x246   : > { %4332 = vmatprep.subr.mxu1 %v5264_v8  ;;  %v5684_v14 = vpop.f32.mrb[1].mxu1  ;;  %v4820_v12 = vld [vmem:[#allocation7 + $0x20] sm:$0xff]  }
 0x247   : > { %v1470_v15 = vpop.f32.mrb[2].mxu1 }
 0x248   : > { %4330 = vmatmul.mubr.msk.f32.vlgmr.msra.gmra.mrb[4].mxu1 %vm1489_vm1, %v1384_v9  ;;  %1817 = vrot.lane.b32.xlu1 %v1384_v9, %s5266_s28  ;;  %v1471_v16 = vpop.f32.mrb[3].mxu1 }
 0x249   : > { %1651 = vrot.lane.b32.xlu0 %v1384_v9, %s5267_s14  ;;  %4334 = vmatprep.mubr.msk.f32.mxu1 %vm5265_vm0, %v5264_v8  ;;  %v4821_v16 = vld [vmem:[#allocation7 + $0x28] sm:$0xff]  }
 0x24a   : > { %4333 = vmatpush3.msra.mxu1 %v5682_v13 }
 0x24b   : > { %4342 = vmatprep.subr.mxu1 %v5264_v8 }
 0x24c   : > { %1982 = vrot.lane.b32.xlu1 %v1384_v9, %s5268_s18  ;;  %v4818_v9 = vld [vmem:[#allocation7 + $0x10] sm:$0xff]  }
 0x24d   : > { %1984 = vrot.lane.b32.xlu0 %v1386_v10, %s5268_s18  ;;  %v4819_v10 = vld [vmem:[#allocation7 + $0x18] sm:$0xff]  }
 0x2b6   : > { %v1654_v17 = vpop.permute.xlu0 %1653  ;;  %v1820_v18 = vpop.permute.xlu1 %1819 }
 0x2b7   : > { %4338 = vmatpush3.xpose.msk.msra.mxu0 %vm1489_vm1, %v1654_v17  ;;  %v4822_v17 = vld [vmem:[#allocation7 + $0x30] sm:$0xff]  }
 0x2b8   : > { %4347 = vmatprep.subr.mxu0 %v5264_v8 }
 0x2ba   : > { %v1818_v20 = vpop.permute.xlu1 %1817 }
 0x2bb   : > { %v1652_v19 = vpop.permute.xlu0 %1651 }
 0x2bc   : > { %4340 = vmatmul.mubr.msk.f32.vlgmr.msra.gmra.mrb[4].mxu0 %vm1489_vm1, %v1652_v19 }
 0x2bd   : > { %4348 = vmatpush3.xpose.msk.msra.mxu0 %vm1489_vm1, %v1820_v18  ;;  %4349 = vmatprep.mubr.msk.f32.mxu0 %vm5265_vm0, %v5264_v8  ;;  %v4823_v18 = vld [vmem:[#allocation7 + $0x38] sm:$0xff]  }
 0x2be   : > { %4357 = vmatprep.subr.mxu0 %v5264_v8  ;;  %v1983_v22 = vpop.permute.xlu1 %1982 }
 0x2bf   : > { %v1985_v21 = vpop.permute.xlu0 %1984 }
 0x2c0   : > { %4350 = vmatmul.mubr.msk.f32.vlgmr.msra.gmra.mrb[6].mxu0 %vm1489_vm1, %v1818_v20 }
 0x2c1   : > { %4358 = vmatpush3.xpose.msk.msra.mxu0 %vm1489_vm1, %v1985_v21  ;;  %4359 = vmatprep.mubr.msk.f32.mxu0 %vm5265_vm0, %v5264_v8 }
 0x2c2   : > { %4367 = vmatprep.subr.bf16.mxu0 %v5264_v8 }
 0x2c4   : > { %4360 = vmatmul.mubr.msk.f32.vlgmr.msra.gmra.mrb[8].mxu0 %vm1489_vm1, %v1983_v22 }
 0x2c5   : > { %4383 = vmatprep.mubr.msk.bf16.mxu0 %vm5265_vm0, %v5264_v8  ;;  %4368 = vmatpush3.bf16.msra.mxu0 %v4816_v6 }
 0x2c6   : > { %4369 = vmatprep.subr.bf16.mxu0 %v5264_v8 }
 0x2c9   : > { %4370 = vmatpush3.bf16.msra.mxu0 %v4817_v7 }
 0x2ca   : > { %4371 = vmatprep.subr.bf16.mxu0 %v5264_v8 }
 0x2cd   : > { %4372 = vmatpush3.bf16.msra.mxu0 %v4818_v9  ;;  %v2265_v9 = vlaneseq }
 0x2ce   : > { %4373 = vmatprep.subr.bf16.mxu0 %v5264_v8 }
 0x2d1   : > { %4374 = vmatpush3.bf16.msra.mxu0 %v4819_v10 }
 0x2d2   : > { %4375 = vmatprep.subr.bf16.mxu0 %v5264_v8 }
 0x2d5   : > { %4376 = vmatpush3.bf16.msra.mxu0 %v4820_v12 }
 0x2d6   : > { %4377 = vmatprep.subr.bf16.mxu0 %v5264_v8 }
 0x2d9   : > { %4378 = vmatpush3.bf16.msra.mxu0 %v4821_v16 }
 0x2da   : > { %4379 = vmatprep.subr.bf16.mxu0 %v5264_v8 }
 0x2dd   : > { %4380 = vmatpush3.bf16.msra.mxu0 %v4822_v17 }
 0x2de   : > { %4381 = vmatprep.subr.bf16.mxu0 %v5264_v8 }
 0x2e1   : > { %4382 = vmatpush3.bf16.msra.mxu0 %v4823_v18 }
 0x31b   : > { %v1562_v23 = vpop.f32.mrb[4].mxu1 }
 0x31c   : > { %v4331_v24 = vpop.f32.mrb[5].mxu1  ;;  %v1567_v25 = vsel %vm1566_vm2, %v1562_v23, -inf }
 0x31d   : > { %1568 = vmax.xlane.f32.xlu0 %v1567_v25 }
 0x38f   : > { %v1725_v26 = vpop.f32.mrb[4].mxu0 }
 0x390   : > { %v4341_v27 = vpop.f32.mrb[5].mxu0  ;;  %v1729_v28 = vsel %vm1566_vm2, %v1725_v26, -inf }
 0x391   : > { %1730 = vmax.xlane.f32.xlu1 %v1729_v28 }
 0x393   : > { %v1891_v29 = vpop.f32.mrb[6].mxu0 }
 0x394   : > { %v4351_v30 = vpop.f32.mrb[7].mxu0  ;;  %v1895_v31 = vsel %vm1566_vm2, %v1891_v29, -inf }
 0x395   : > { %1896 = vmax.xlane.f32.xlu0 %v1895_v31 }
 0x397   : > { %v2056_v32 = vpop.f32.mrb[8].mxu0 }
 0x398   : > { %v4361_v33 = vpop.f32.mrb[9].mxu0  ;;  %v2060_v34 = vsel %vm1566_vm2, %v2056_v32, -inf }
 0x399   : > { %2061 = vmax.xlane.f32.xlu0 %v2060_v34 }
 0x3a2   : > { %1741 = vrot.lane.b32.xlu1 %v5682_v13, %s5267_s14 }
 0x3aa   : > { %v1569_v35 = vpop.xlane.xlu0 %1568 }
 0x3ab   : > { %v1570_v36 = vsub.f32 %v1562_v23, %v1569_v35 }
 0x3ad   : > { %v1571_v37 = vmul.f32 1.442695, %v1570_v36 }
 0x3af   : > { %4896 = vpow2.f32 %v1571_v37  ;;  %v4824_v37 = vld [vmem:[#allocation8] ss:$8 sps:$4 sm:$0xff]  }
 0x3b9   : > { %v4897_v38 = vpop.eup %4896 }
 0x3ba   : > { %v1573_v39 = vsel %vm1566_vm2, %v4897_v38, 0.0 }
 0x3c6   : > { %1574 = vadd.xlane.f32.xlu1 %v1573_v39  ;;  %v4829_v39 = vld [vmem:[#allocation8 + $0x14] ss:$8 sps:$4 sm:$0xff]  }
 0x41e   : > { %v1731_v40 = vpop.xlane.xlu1 %1730 }
 0x41f   : > { %v1732_v41 = vsub.f32 %v1725_v26, %v1731_v40  ;;  %v4827_v40 = vld [vmem:[#allocation8 + $0x10] ss:$8 sps:$4 sm:$0xff]  }
 0x421   : > { %v1733_v42 = vmul.f32 1.442695, %v1732_v41  ;;  %v4832_v41 = vld [vmem:[#allocation8 + $0x24] ss:$8 sps:$4 sm:$0xff]  }
 0x422   : > { %v1897_v43 = vpop.xlane.xlu0 %1896  ;;  %v1742_v55 = vpop.permute.xlu1 %1741 }
 0x423   : > { %4898 = vpow2.f32 %v1733_v42  ;;  %v1898_v44 = vsub.f32 %v1891_v29, %v1897_v43  ;;  %v4830_v42 = vld [vmem:[#allocation8 + $0x20] ss:$8 sps:$4 sm:$0xff]  }
 0x425   : > { %v1899_v45 = vmul.f32 1.442695, %v1898_v44 }
 0x426   : > { %v2062_v46 = vpop.xlane.xlu0 %2061 }
 0x427   : > { %4900 = vpow2.f32 %v1899_v45  ;;  %v2063_v47 = vsub.f32 %v2056_v32, %v2062_v46  ;;  %v4835_v46 = vld [vmem:[#allocation8 + $0x34] ss:$8 sps:$4 sm:$0xff]  }
 0x429   : > { %v2064_v48 = vmul.f32 1.442695, %v2063_v47  ;;  %v4833_v47 = vld [vmem:[#allocation8 + $0x30] ss:$8 sps:$4 sm:$0xff]  }
 0x42b   : > { %4902 = vpow2.f32 %v2064_v48  ;;  %v4838_v48 = vld [vmem:[#allocation8 + $0x44] ss:$8 sps:$4 sm:$0xff]  }
 0x42d   : > { %v4899_v49 = vpop.eup %4898 }
 0x42e   : > { %v1735_v50 = vsel %vm1566_vm2, %v4899_v49, 0.0 }
 0x42f   : > { %1736 = vadd.xlane.f32.xlu0 %v1735_v50  ;;  %v4841_v50 = vld [vmem:[#allocation8 + $0x54] ss:$8 sps:$4 sm:$0xff]  }
 0x431   : > { %v4901_v51 = vpop.eup %4900 }
 0x432   : > { %v1901_v52 = vsel %vm1566_vm2, %v4901_v51, 0.0 }
 0x433   : > { %1902 = vadd.xlane.f32.xlu1 %v1901_v52  ;;  %v4844_v52 = vld [vmem:[#allocation8 + $0x64] ss:$8 sps:$4 sm:$0xff]  }
 0x435   : > { %v4903_v53 = vpop.eup %4902 }
 0x436   : > { %v2066_v54 = vsel %vm1566_vm2, %v4903_v53, 0.0 }
 0x437   : > { %2067 = vadd.xlane.f32.xlu0 %v2066_v54  ;;  %v4847_v54 = vld [vmem:[#allocation8 + $0x74] ss:$8 sps:$4 sm:$0xff]  }
 0x444   : > { %2071 = vrot.lane.b32.xlu1 %v5682_v13, %s5268_s18 }
 0x44d   : > { %1906 = vrot.lane.b32.xlu0 %v5682_v13, %s5266_s28 }
 0x453   : > { %v1575_v56 = vpop.xlane.xlu1 %1574 }
 0x454   : > { %4904 = vrcp.f32 %v1575_v56  ;;  %v5269_v56 = vmov 0  }
 0x45e   : > { %v4905_v57 = vpop.eup %4904 }
 0x45f   : > { %v1577_v58 = vmul.f32 %v4905_v57, %v4897_v38  ;;  %v4826_v38 = vld [vmem:[#allocation8 + $0x4] ss:$8 sps:$4 sm:$0xff]  }
 0x460   : > { %v4848_v57 = vld [vmem:[#allocation10 + $0x40] sm:$0xff]  }
 0x461   : > { %4335 = vmatmul.mubr.msk.f32.vlgmr.msra.gmra.mrb[6].mxu1 %vm1566_vm2, %v1577_v58  ;;  %v4849_v58 = vld [vmem:[#allocation10] sm:$0xff]   ;;  %4247 = vmatprep.subr.bf16.mxu0 %v4848_v57 }
 0x462   : > { %4343 = vmatpush3.msra.mxu1 %v1742_v55  ;;  %4344 = vmatprep.mubr.msk.f32.mxu1 %vm5265_vm0, %v5264_v8  ;;  %v4845_v55 = vld [vmem:[#allocation8 + $0x70] ss:$8 sps:$4 sm:$0xff]  }
 0x463   : > { %4352 = vmatprep.subr.mxu1 %v5264_v8 }
 0x4bc   : > { %v1737_v59 = vpop.xlane.xlu0 %1736 }
 0x4bd   : > { %4906 = vrcp.f32 %v1737_v59  ;;  %v4850_v59 = vld [vmem:[#allocation10 + $0x48] sm:$0xff]  }
 0x4c0   : > { %v1903_v60 = vpop.xlane.xlu1 %1902 }
 0x4c1   : > { %4908 = vrcp.f32 %v1903_v60  ;;  %v4851_v60 = vld [vmem:[#allocation10 + $0x8] sm:$0xff]  }
 0x4c4   : > { %v2068_v61 = vpop.xlane.xlu0 %2067  ;;  %v2072_v3 = vpop.permute.xlu1 %2071 }
 0x4c5   : > { %4910 = vrcp.f32 %v2068_v61  ;;  %v4852_v61 = vld [vmem:[#allocation10 + $0x50] sm:$0xff]  }
 0x4c7   : > { %v4907_v62 = vpop.eup %4906 }
 0x4c8   : > { %v1739_v63 = vmul.f32 %v4907_v62, %v4899_v49  ;;  %v1907_v0 = vpop.permute.xlu0 %1906  ;;  %v4836_v49 = vld [vmem:[#allocation8 + $0x40] ss:$8 sps:$4 sm:$0xff]   ;;  %v4853_v62 = vld [vmem:[#allocation10 + $0x10] sm:$0xff]  }
 0x4ca   : > { %4345 = vmatmul.mubr.msk.f32.vlgmr.msra.gmra.mrb[8].mxu1 %vm1566_vm2, %v1739_v63  ;;  %v4854_v63 = vld [vmem:[#allocation10 + $0x58] sm:$0xff]  }
 0x4cb   : > { %v4909_v1 = vpop.eup %4908  ;;  %4353 = vmatpush3.msra.mxu1 %v1907_v0  ;;  %4354 = vmatprep.mubr.msk.f32.mxu1 %vm5265_vm0, %v5264_v8  ;;  %v4855_v0 = vld [vmem:[#allocation10 + $0x18] sm:$0xff]  }
 0x4cc   : > { %v1905_v2 = vmul.f32 %v4909_v1, %v4901_v51  ;;  %4362 = vmatprep.subr.mxu1 %v5264_v8  ;;  %v4839_v51 = vld [vmem:[#allocation8 + $0x50] ss:$8 sps:$4 sm:$0xff]   ;;  %v4856_v1 = vld [vmem:[#allocation10 + $0x60] sm:$0xff]  }
 0x4ce   : > { %4355 = vmatmul.mubr.msk.f32.vlgmr.msra.gmra.mrb[10].mxu1 %vm1566_vm2, %v1905_v2  ;;  %v4857_v2 = vld [vmem:[#allocation10 + $0x20] sm:$0xff]  }
 0x4cf   : > { %v4911_v4 = vpop.eup %4910  ;;  %4363 = vmatpush3.msra.mxu1 %v2072_v3  ;;  %4364 = vmatprep.mubr.msk.f32.mxu1 %vm5265_vm0, %v5264_v8  ;;  %v4858_v3 = vld [vmem:[#allocation10 + $0x68] sm:$0xff]  }
 0x4d0   : > { %v2070_v5 = vmul.f32 %v4911_v4, %v4903_v53  ;;  %2404 = vmatprep.subr.bf16.mxu1 %v4826_v38  ;;  %v4842_v53 = vld [vmem:[#allocation8 + $0x60] ss:$8 sps:$4 sm:$0xff]  }
 0x4d1   : > { %v4859_v4 = vld [vmem:[#allocation10 + $0x28] sm:$0xff]  }
 0x4d2   : > { %4365 = vmatmul.mubr.msk.f32.vlgmr.msra.gmra.mrb[12].mxu1 %vm1566_vm2, %v2070_v5  ;;  %v4860_v5 = vld [vmem:[#allocation10 + $0x70] sm:$0xff]  }
 0x4d3   : > { %2405 = vmatpush1.bf16.msra.mxu1 %v4824_v37  ;;  %2436 = vmatprep.mubr.bf16.mxu1 %v5269_v56 }
 0x4d4   : > { %2406 = vmatprep.subr.bf16.mxu1 %v4829_v39 }
 0x4d7   : > { %2407 = vmatpush1.bf16.msra.mxu1 %v4827_v40 }
 0x4d8   : > { %2408 = vmatprep.subr.bf16.mxu1 %v4832_v41  ;;  %v4864_v41 = vld [vmem:[%s5977_s5] sm:$0xff]  }
 0x4db   : > { %2409 = vmatpush1.bf16.msra.mxu1 %v4830_v42  ;;  %v4865_v42 = vld [vmem:[%s5977_s5 + $0x8] sm:$0xff]  }
 0x4dc   : > { %2410 = vmatprep.subr.bf16.mxu1 %v4835_v46  ;;  %v4866_v46 = vld [vmem:[%s5977_s5 + $0x10] sm:$0xff]  }
 0x4df   : > { %2411 = vmatpush1.bf16.msra.mxu1 %v4833_v47  ;;  %v4867_v47 = vld [vmem:[%s5977_s5 + $0x18] sm:$0xff]  }
 0x4e0   : > { %2412 = vmatprep.subr.bf16.mxu1 %v4838_v48  ;;  %v4868_v48 = vld [vmem:[%s5977_s5 + $0x20] sm:$0xff]  }
 0x4e3   : > { %2413 = vmatpush1.bf16.msra.mxu1 %v4836_v49  ;;  %v4869_v49 = vld [vmem:[%s5977_s5 + $0x28] sm:$0xff]  }
 0x4e4   : > { %2414 = vmatprep.subr.bf16.mxu1 %v4841_v50  ;;  %v4870_v50 = vld [vmem:[%s5977_s5 + $0x30] sm:$0xff]  }
 0x4e7   : > { %2415 = vmatpush1.bf16.msra.mxu1 %v4839_v51  ;;  %v4871_v51 = vld [vmem:[%s5977_s5 + $0x38] sm:$0xff]  }
 0x4e8   : > { %2416 = vmatprep.subr.bf16.mxu1 %v4844_v52 }
 0x4eb   : > { %2417 = vmatpush1.bf16.msra.mxu1 %v4842_v53 }
 0x4ec   : > { %2418 = vmatprep.subr.bf16.mxu1 %v4847_v54 }
 0x4ef   : > { %2419 = vmatpush1.bf16.msra.mxu1 %v4845_v55 }
 0x4f0   : > { %4387 = vmatprep.subr.bf16.mxu1 %v5264_v8 }
 0x534   : > { %v1647_v11 = vpop.f32.mrb[6].mxu1 }
 0x535   : > { %v4336_v15 = vpop.f32.mrb[7].mxu1 }
 0x536   : > { %v5750_v15 = vld [vmem:[#allocation11] sm:$0x1f] }
 0x59d   : > { %v1813_v19 = vpop.f32.mrb[8].mxu1 }
 0x59e   : > { %2148 = vrot.lane.b32.xlu1 %v1813_v19, %s5268_s18  ;;  %v4346_v20 = vpop.f32.mrb[9].mxu1  ;;  %s5275_s18 = smov 72  }
 0x5a1   : > { %v1978_v21 = vpop.f32.mrb[10].mxu1 }
 0x5a2   : > { %2152 = vrot.lane.b32.xlu0 %v1978_v21, %s5266_s28  ;;  %v4356_v22 = vpop.f32.mrb[11].mxu1 }
 0x5a5   : > { %v2143_v23 = vpop.f32.mrb[12].mxu1 }
 0x5a6   : > { %2156 = vrot.lane.b32.xlu1 %v2143_v23, %s5267_s14  ;;  %v4366_v24 = vpop.f32.mrb[13].mxu1 }
 0x5a7   : > { %v4861_v24 = vld [vmem:[#allocation10 + $0x30] sm:$0xff]  }
 0x610   : > { %v2149_v25 = vpop.permute.xlu1 %2148 }
 0x611   : > { %v2159_v27 = vsel %vm1489_vm1, %v1647_v11, %v2149_v25  ;;  %v5747_v11 = vshrl.u32 %v2265_v9, 7  ;;  %v4862_v25 = vld [vmem:[#allocation10 + $0x78] sm:$0xff]   ;;  %v4880_v9 = vld [vmem:[#allocation13 + $0x60] sm:$0xff]  }
 0x613   : > { %v2267_v12 = vsub.s32 0, %v5747_v11  ;;  %v2272_v16 = vsub.s32 1, %v5747_v11  ;;  %v2599_v55 = vsub.s32 2, %v5747_v11  ;;  %v2604_v56 = vsub.s32 3, %v5747_v11 }
 0x614   : > { %v2153_v26 = vpop.permute.xlu0 %2152 }
 0x615   : > { %v2161_v28 = vsel %vm2160_vm3, %v2159_v27, %v2153_v26  ;;  %v2268_v17 = vrot.slane %v5750_v15, %v2267_v12  ;;  %v2273_v20 = vrot.slane %v5750_v15, %v2272_v16  ;;  %v4863_v26 = vld [vmem:[#allocation10 + $0x38] sm:$0xff]   ;;  %v2600_v57 = vrot.slane %v5750_v15, %v2599_v55 }
 0x618   : > { %v2157_v29 = vpop.permute.xlu1 %2156 }
 0x619   : > { %v2163_v30 = vsel %vm2162_vm4, %v2161_v28, %v2157_v29 }
 0x61a   : > { %v2164_v31 = vpack.c.bf16 %v2163_v30, %v2163_v30 }
 0x61c   : > { %4384 = vmatmul.mubr.bf16.vlgmr.msra.gmra.mrb[12].mxu0 %v2164_v31 }
 0x61d   : > { %4248 = vmatpush3.bf16.msra.mxu0 %v4849_v58 }
 0x61e   : > { %4249 = vmatprep.subr.bf16.mxu0 %v4850_v59 }
 0x621   : > { %4250 = vmatpush3.bf16.msra.mxu0 %v4851_v60  ;;  %v2605_v60 = vrot.slane %v5750_v15, %v2604_v56 }
 0x622   : > { %4251 = vmatprep.subr.bf16.mxu0 %v4852_v61 }
 0x625   : > { %4252 = vmatpush3.bf16.msra.mxu0 %v4853_v62 }
 0x626   : > { %4253 = vmatprep.subr.bf16.mxu0 %v4854_v63 }
 0x629   : > { %4254 = vmatpush3.bf16.msra.mxu0 %v4855_v0  ;;  %v4872_v0 = vld [vmem:[#allocation13 + $0x40] sm:$0xff]  }
 0x62a   : > { %4255 = vmatprep.subr.bf16.mxu0 %v4856_v1  ;;  %v4873_v1 = vld [vmem:[#allocation13] sm:$0xff]  }
 0x62d   : > { %4256 = vmatpush3.bf16.msra.mxu0 %v4857_v2  ;;  %v4874_v2 = vld [vmem:[#allocation13 + $0x48] sm:$0xff]  }
 0x62e   : > { %4257 = vmatprep.subr.bf16.mxu0 %v4858_v3  ;;  %v4875_v3 = vld [vmem:[#allocation13 + $0x8] sm:$0xff]  }
 0x631   : > { %4258 = vmatpush3.bf16.msra.mxu0 %v4859_v4  ;;  %v4876_v4 = vld [vmem:[#allocation13 + $0x50] sm:$0xff]  }
 0x632   : > { %4259 = vmatprep.subr.bf16.mxu0 %v4860_v5  ;;  %v4877_v5 = vld [vmem:[#allocation13 + $0x10] sm:$0xff]  }
 0x635   : > { %4260 = vmatpush3.bf16.msra.mxu0 %v4861_v24 }
 0x636   : > { %4261 = vmatprep.subr.bf16.mxu0 %v4862_v25 }
 0x639   : > { %4262 = vmatpush3.bf16.msra.mxu0 %v4863_v26 }
 0x63a   : > { %4278 = vmatprep.subr.bf16.mxu0 %v4872_v0 }
 0x6ef   : > { %v2247_v32 = vpop.f32.mrb[12].mxu0 }
 0x6f0   : > { %v2248_v33 = vadd.f32 %v2247_v32, %v5682_v13  ;;  %v4385_v34 = vpop.f32.mrb[13].mxu0 }
 0x6f1   : > { %v2250_v35 = vpop.f32.mrb[14].mxu0 }
 0x6f2   : > { %2253 = vadd.xlane.f32.xlu0 %v2248_v33  ;;  %v4386_v36 = vpop.f32.mrb[15].mxu0 }
 0x77f   : > { %v2254_v43 = vpop.xlane.xlu0 %2253 }
 0x780   : > { %v2256_v44 = vmul.f32 0.0078125, %v2254_v43 }
 0x782   : > { %v5742_v45 = vsub.f32 %v2248_v33, %v2256_v44 }
 0x784   : > { %v2258_v13 = vmul.f32 %v5742_v45, %v5742_v45 }
 0x786   : > { %2259 = vadd.xlane.f32.xlu1 %v2258_v13 }
 0x813   : > { %v2260_v6 = vpop.xlane.xlu1 %2259 }
 0x814   : > { %v2261_v7 = vmul.f32 0.0078125, %v2260_v6  ;;  %v4878_v6 = vld [vmem:[#allocation13 + $0x58] sm:$0xff]  }
 0x816   : > { %v2262_v10 = vadd.f32 1e-05, %v2261_v7  ;;  %v4879_v7 = vld [vmem:[#allocation13 + $0x18] sm:$0xff]  }
 0x818   : > { %4912 = vrsqrt.f32 %v2262_v10  ;;  %v4881_v10 = vld [vmem:[#allocation13 + $0x20] sm:$0xff]  }
 0x822   : > { %v4913_v18 = vpop.eup %4912 }
 0x823   : > { %v2264_v19 = vmul.f32 %v4913_v18, %v5742_v45  ;;  %v4883_v18 = vld [vmem:[#allocation13 + $0x28] sm:$0xff]  }
 0x825   : > { %v2269_v21 = vmul.f32 %v2268_v17, %v2264_v19  ;;  %v4882_v17 = vld [vmem:[#allocation13 + $0x68] sm:$0xff]   ;;  %v4884_v19 = vld [vmem:[#allocation13 + $0x70] sm:$0xff]  }
 0x827   : > { %v2274_v22 = vadd.f32 %v2273_v20, %v2269_v21  ;;  %v4885_v20 = vld [vmem:[#allocation13 + $0x30] sm:$0xff]   ;;  %v4886_v21 = vld [vmem:[#allocation13 + $0x78] sm:$0xff]  }
 0x829   : > { %v2323_v23 = vpack.c.bf16 %v2274_v22, %v2274_v22 }
 0x82b   : > { %2437 = vmatmul.mubr.bf16.vlgmr.msra.gmra.mrb[16].mxu1 %v2323_v23  ;;  %v2714_v23 = vsub.s32 4, %v5747_v11 }
 0x82c   : > { %4403 = vmatprep.mubr.msk.bf16.mxu1 %vm5265_vm0, %v5264_v8  ;;  %4388 = vmatpush3.bf16.msra.mxu1 %v4864_v41 }
 0x82d   : > { %4389 = vmatprep.subr.bf16.mxu1 %v5264_v8  ;;  %v2715_v24 = vrot.slane %v5750_v15, %v2714_v23 }
 0x830   : > { %4390 = vmatpush3.bf16.msra.mxu1 %v4865_v42 }
 0x831   : > { %4391 = vmatprep.subr.bf16.mxu1 %v5264_v8 }
 0x834   : > { %4392 = vmatpush3.bf16.msra.mxu1 %v4866_v46 }
 0x835   : > { %4393 = vmatprep.subr.bf16.mxu1 %v5264_v8 }
 0x838   : > { %4394 = vmatpush3.bf16.msra.mxu1 %v4867_v47 }
 0x839   : > { %4395 = vmatprep.subr.bf16.mxu1 %v5264_v8 }
 0x83c   : > { %4396 = vmatpush3.bf16.msra.mxu1 %v4868_v48 }
 0x83d   : > { %4397 = vmatprep.subr.bf16.mxu1 %v5264_v8 }
 0x840   : > { %4398 = vmatpush3.bf16.msra.mxu1 %v4869_v49 }
 0x841   : > { %4399 = vmatprep.subr.bf16.mxu1 %v5264_v8 }
 0x844   : > { %4400 = vmatpush3.bf16.msra.mxu1 %v4870_v50 }
 0x845   : > { %4401 = vmatprep.subr.bf16.mxu1 %v5264_v8 }
 0x848   : > { %4402 = vmatpush3.bf16.msra.mxu1 %v4871_v51 }
 0x849   : > { %4407 = vmatprep.subr.mxu1 %v5264_v8 }
 0x8fe   : > { %v2438_v27 = vpop.f32.mrb[16].mxu1 }
 0x8ff   : > { %v2445_v28 = vmax.f32 %v2438_v27, 0.0  ;;  %v2440_v29 = vpop.f32.mrb[17].mxu1 }
 0x900   : > { %v2446_v30 = vmax.f32 %v2440_v29, 0.0  ;;  %v2442_v31 = vpop.f32.mrb[18].mxu1 }
 0x901   : > { %v2443_v32 = vpop.f32.mrb[19].mxu1  ;;  %v2447_v34 = vpack.c.bf16 %v2445_v28, %v2445_v28 }
 0x902   : > { %v2448_v33 = vpack.c.bf16 %v2446_v30, %v2446_v30 }
 0x904   : > { %2577 = vmatprep.mubr.bf16.mxu0 %v2448_v33 }
 0x905   : > { %2578 = vmatmul.mubr.bf16.vlgmr.msra.gmra.mrb[16].mxu0 %v2447_v34 }
 0x906   : > { %4279 = vmatpush3.bf16.msra.mxu0 %v4873_v1 }
 0x907   : > { %4280 = vmatprep.subr.bf16.mxu0 %v4874_v2 }
 0x90a   : > { %4281 = vmatpush3.bf16.msra.mxu0 %v4875_v3 }
 0x90b   : > { %4282 = vmatprep.subr.bf16.mxu0 %v4876_v4 }
 0x90e   : > { %4283 = vmatpush3.bf16.msra.mxu0 %v4877_v5 }
 0x90f   : > { %4284 = vmatprep.subr.bf16.mxu0 %v4878_v6 }
 0x912   : > { %4285 = vmatpush3.bf16.msra.mxu0 %v4879_v7 }
 0x913   : > { %4286 = vmatprep.subr.bf16.mxu0 %v4880_v9 }
 0x916   : > { %4287 = vmatpush3.bf16.msra.mxu0 %v4881_v10 }
 0x917   : > { %4288 = vmatprep.subr.bf16.mxu0 %v4882_v17 }
 0x91a   : > { %4289 = vmatpush3.bf16.msra.mxu0 %v4883_v18 }
 0x91b   : > { %4290 = vmatprep.subr.bf16.mxu0 %v4884_v19 }
 0x91e   : > { %4291 = vmatpush3.bf16.msra.mxu0 %v4885_v20 }
 0x91f   : > { %4292 = vmatprep.subr.bf16.mxu0 %v4886_v21 }
 0x9d8   : > { %v4263_v35 = vpop.f32.mrb[16].mxu0 }
 0x9d9   : > { %v4264_v36 = vpop.f32.mrb[17].mxu0 }
 0x9da   : > { %v4265_v37 = vadd.f32 %v4264_v36, %v4263_v35  ;;  %v4266_v38 = vpop.f32.mrb[18].mxu0 }
 0x9db   : > { %v4267_v39 = vpop.f32.mrb[19].mxu0 }
 0x9dc   : > { %v2585_v40 = vadd.f32 %v4265_v37, %v2274_v22  ;;  %v4887_v22 = vld [vmem:[#allocation13 + $0x38] sm:$0xff]  }
 0x9dd   : > { %4293 = vmatpush3.bf16.msra.mxu0 %v4887_v22 }
 0x9de   : > { %2586 = vadd.xlane.f32.xlu0 %v2585_v40  ;;  %4447 = vmatprep.subr.bf16.mxu0 %v5264_v8 }
 0xa6b   : > { %v2587_v43 = vpop.xlane.xlu0 %2586 }
 0xa6c   : > { %v2588_v44 = vmul.f32 0.0078125, %v2587_v43 }
 0xa6e   : > { %v2589_v45 = vsub.f32 %v2585_v40, %v2588_v44 }
 0xa70   : > { %v2590_v13 = vmul.f32 %v2589_v45, %v2589_v45 }
 0xa72   : > { %2591 = vadd.xlane.f32.xlu0 %v2590_v13 }
 0xaff   : > { %v2592_v52 = vpop.xlane.xlu0 %2591 }
 0xb00   : > { %v2593_v53 = vmul.f32 0.0078125, %v2592_v52 }
 0xb02   : > { %v2594_v54 = vadd.f32 1e-05, %v2593_v53 }
 0xb04   : > { %4914 = vrsqrt.f32 %v2594_v54 }
 0xb0e   : > { %v4915_v58 = vpop.eup %4914 }
 0xb0f   : > { %v2596_v59 = vmul.f32 %v4915_v58, %v2589_v45 }
 0xb11   : > { %v2601_v61 = vmul.f32 %v2600_v57, %v2596_v59 }
 0xb13   : > { %v2606_v62 = vadd.f32 %v2605_v60, %v2601_v61 }
 0xb15   : > { %v2607_v63 = vpack.c.bf16 %v2606_v62, %v2606_v62 }
 0xb17   : > { %4404 = vmatmul.mubr.bf16.vlgmr.msra.gmra.mrb[20].mxu1 %v2607_v63 }
 0xb18   : > { %4409 = vmatprep.mubr.msk.f32.mxu1 %vm5265_vm0, %v5264_v8 }
 0xbea   : > { %v2706_v25 = vpop.f32.mrb[20].mxu1 }
 0xbeb   : > { %v2707_v26 = vadd.f32 %v2706_v25, %v5684_v14  ;;  %v4405_v27 = vpop.f32.mrb[21].mxu1 }
 0xbec   : > { %v2709_v28 = vpop.f32.mrb[22].mxu1 }
 0xbed   : > { %v2716_v29 = vadd.f32 %v2715_v24, %v2707_v26  ;;  %v4406_v30 = vpop.f32.mrb[23].mxu1 }
 0xbef   : > { %v4177_v31 = vmul.f32 -1.442695, %v2716_v29 }
 0xbf1   : > { %4916 = vpow2.f32 %v4177_v31 }
 0xbfb   : > { %v4917_v32 = vpop.eup %4916 }
 0xbfc   : > { %v2720_v33 = vadd.f32 1.0, %v4917_v32 }
 0xbfe   : > { %4918 = vrcp.f32 %v2720_v33 }
 0xc08   : > { %v4919_v34 = vpop.eup %4918 }
 0xc09   : > { %v2723_v35 = vmul.f32 %v4919_v34, %v2606_v62 }
 0xc0b   : > { %v2724_v36 = vpack.c.bf16 %v2723_v35, %v2723_v35 }
 0xc0d   : > { %2885 = vmatprep.mubr.bf16.mxu0 %v2724_v36 }
 0xc0e   : > { %2886 = vmatmul.mubr.bf16.vlgmr.msra.gmra.mrb[20].mxu0 %v2607_v63 }
 0xc0f   : > { %4451 = vmatprep.mubr.msk.bf16.mxu0 %vm5265_vm0, %v5264_v8 }
 0xce1   : > { %v4294_v15 = vpop.f32.mrb[20].mxu0 }
 0xce2   : > { %v4295_v37 = vpop.f32.mrb[21].mxu0 }
 0xce3   : > { %v5810_v14 = vadd.f32 %v4295_v37, %v4294_v15  ;;  %v4297_v38 = vpop.f32.mrb[22].mxu0 }
 0xce4   : > { %v4298_v39 = vpop.f32.mrb[23].mxu0 }
 0xce5   : > { %2898 = vrot.lane.b32.xlu1 %v5810_v14, %s5267_s14  ;;  %s5273_s14 = smov 112  }
 0xce9   : > { %3063 = vrot.lane.b32.xlu1 %v5810_v14, %s5270_s11 }
 0xced   : > { %3061 = vrot.lane.b32.xlu1 %v5810_v14, %s5271_s10  ;;  %s6017_s10 = sld [smem:[#allocation27_spill]] }
 0xd57   : > { %v2899_v40 = vpop.permute.xlu1 %2898 }
 0xd58   : > { %4408 = vmatpush3.xpose.msk.msra.mxu1 %vm1566_vm2, %v2899_v40 }
 0xd59   : > { %4412 = vmatprep.subr.mxu1 %v5264_v8 }
 0xd5b   : > { %4410 = vmatmul.mubr.msk.f32.vlgmr.msra.gmra.mrb[14].mxu1 %vm1566_vm2, %v5810_v14  ;;  %v3064_v51 = vpop.permute.xlu1 %3063 }
 0xd5c   : > { %4414 = vmatprep.mubr.msk.f32.mxu1 %vm5265_vm0, %v5264_v8 }
 0xd5f   : > { %v3062_v53 = vpop.permute.xlu1 %3061 }
 0xe2e   : > { %v2970_v41 = vpop.f32.mrb[14].mxu1 }
 0xe2f   : > { %v4411_v42 = vpop.f32.mrb[15].mxu1  ;;  %v2974_v43 = vsel %vm1566_vm2, %v2970_v41, -inf }
 0xe30   : > { %2975 = vmax.xlane.f32.xlu0 %v2974_v43  ;;  %v4888_v43 = vld [vmem:[#allocation14] sm:$0xff]  }
 0xe31   : > { %4448 = vmatpush3.bf16.msra.mxu0 %v4888_v43 }
 0xe32   : > { %4449 = vmatprep.subr.bf16.mxu0 %v5264_v8 }
 0xebd   : > { %v2976_v44 = vpop.xlane.xlu0 %2975 }
 0xebe   : > { %v2977_v45 = vsub.f32 %v2970_v41, %v2976_v44  ;;  %v4889_v44 = vld [vmem:[#allocation14 + $0x8] sm:$0xff]  }
 0xebf   : > { %4450 = vmatpush3.bf16.msra.mxu0 %v4889_v44 }
 0xec0   : > { %v2978_v13 = vmul.f32 1.442695, %v2977_v45  ;;  %4463 = vmatprep.subr.bf16.mxu0 %v5264_v8 }
 0xec2   : > { %4920 = vpow2.f32 %v2978_v13 }
 0xecc   : > { %v4921_v46 = vpop.eup %4920 }
 0xecd   : > { %v2980_v47 = vsel %vm1566_vm2, %v4921_v46, 0.0 }
 0xece   : > { %2981 = vadd.xlane.f32.xlu0 %v2980_v47 }
 0xee4   : > { %2985 = vrot.lane.b32.xlu0 %v5810_v14, %s5266_s28  ;;  %s5272_s28 = smov 56  }
 0xf5b   : > { %v2982_v48 = vpop.xlane.xlu0 %2981 }
 0xf5c   : > { %4922 = vrcp.f32 %v2982_v48 }
 0xf5f   : > { %v5826_v49 = vpop.permute.xlu0 %2985 }
 0xf60   : > { %4413 = vmatpush3.msra.mxu1 %v5826_v49 }
 0xf61   : > { %4417 = vmatprep.subr.mxu1 %v5264_v8 }
 0xf66   : > { %v4923_v50 = vpop.eup %4922 }
 0xf67   : > { %v2984_v52 = vmul.f32 %v4923_v50, %v4921_v46 }
 0xf69   : > { %4415 = vmatmul.mubr.msk.f32.vlgmr.msra.gmra.mrb[24].mxu1 %vm1566_vm2, %v2984_v52 }
 0xf6a   : > { %4418 = vmatpush3.xpose.msk.msra.mxu1 %vm1566_vm2, %v3064_v51  ;;  %4419 = vmatprep.mubr.msk.f32.mxu1 %vm5265_vm0, %v5264_v8 }
 0xf6b   : > { %4422 = vmatprep.subr.mxu1 %v5264_v8 }
 0xf6d   : > { %4420 = vmatmul.mubr.msk.f32.vlgmr.msra.gmra.mrb[26].mxu1 %vm1566_vm2, %v3062_v53 }
 0xf6e   : > { %4424 = vmatprep.mubr.msk.f32.mxu1 %vm5265_vm0, %v5264_v8 }
0x103c   : > { %v5838_v54 = vpop.f32.mrb[24].mxu1 }
0x103d   : > { %v4416_v57 = vpop.f32.mrb[25].mxu1 }
0x1040   : > { %v3135_v58 = vpop.f32.mrb[26].mxu1 }
0x1041   : > { %v4421_v59 = vpop.f32.mrb[27].mxu1  ;;  %v3139_v60 = vsel %vm1566_vm2, %v3135_v58, -inf }
0x1042   : > { %3140 = vmax.xlane.f32.xlu1 %v3139_v60 }
0x1053   : > { %3150 = vrot.lane.b32.xlu1 %v5810_v14, %s5272_s28  ;;  %s6014_s28 = sld [smem:[#allocation24_spill]] }
0x1057   : > { %3226 = vrot.lane.b32.xlu1 %v5810_v14, %s5273_s14  ;;  %s6016_s14 = sld [smem:[#allocation26_spill]] }
0x10cf   : > { %v3141_v61 = vpop.xlane.xlu1 %3140 }
0x10d0   : > { %v3142_v62 = vsub.f32 %v3135_v58, %v3141_v61 }
0x10d2   : > { %v3143_v63 = vmul.f32 1.442695, %v3142_v62 }
0x10d3   : > { %v3151_v0 = vpop.permute.xlu1 %3150 }
0x10d4   : > { %4924 = vpow2.f32 %v3143_v63  ;;  %4423 = vmatpush3.msra.mxu1 %v3151_v0 }
0x10d5   : > { %4427 = vmatprep.subr.mxu1 %v5264_v8 }
0x10d7   : > { %v3227_v7 = vpop.permute.xlu1 %3226 }
0x10de   : > { %v4925_v1 = vpop.eup %4924 }
0x10df   : > { %v3145_v2 = vsel %vm1566_vm2, %v4925_v1, 0.0 }
0x10e0   : > { %3146 = vadd.xlane.f32.xlu0 %v3145_v2 }
0x10f6   : > { %3228 = vrot.lane.b32.xlu0 %v5810_v14, %s5274_s26  ;;  %s3816_s26 = scalar_lea.sflag [#allocation4], %s5627_s20 }
0x116d   : > { %v3147_v3 = vpop.xlane.xlu0 %3146 }
0x116e   : > { %4926 = vrcp.f32 %v3147_v3  ;;  %v4890_v3 = vld [vmem:[%s6014_s28] sm:$0xff]  }
0x1171   : > { %v3229_v6 = vpop.permute.xlu0 %3228 }
0x1178   : > { %v4927_v4 = vpop.eup %4926 }
0x1179   : > { %v3149_v5 = vmul.f32 %v4927_v4, %v4925_v1 }
0x117b   : > { %4425 = vmatmul.mubr.msk.f32.vlgmr.msra.gmra.mrb[28].mxu1 %vm1566_vm2, %v3149_v5 }
0x117c   : > { %4428 = vmatpush3.xpose.msk.msra.mxu1 %vm1566_vm2, %v3229_v6  ;;  %4429 = vmatprep.mubr.msk.f32.mxu1 %vm5265_vm0, %v5264_v8 }
0x117d   : > { %4432 = vmatprep.subr.mxu1 %v5264_v8 }
0x117f   : > { %4430 = vmatmul.mubr.msk.f32.vlgmr.msra.gmra.mrb[30].mxu1 %vm1566_vm2, %v3227_v7 }
0x1180   : > { %4434 = vmatprep.mubr.msk.f32.mxu1 %vm5265_vm0, %v5264_v8 }
0x124e   : > { %v3222_v9 = vpop.f32.mrb[28].mxu1 }
0x124f   : > { %v4426_v10 = vpop.f32.mrb[29].mxu1 }
0x1252   : > { %v3300_v17 = vpop.f32.mrb[30].mxu1 }
0x1253   : > { %v4431_v18 = vpop.f32.mrb[31].mxu1  ;;  %v3304_v19 = vsel %vm1566_vm2, %v3300_v17, -inf }
0x1254   : > { %3305 = vmax.xlane.f32.xlu1 %v3304_v19 }
0x1265   : > { %3393 = vrot.lane.b32.xlu1 %v5810_v14, %s5275_s18 }
0x1269   : > { %3391 = vrot.lane.b32.xlu1 %v5810_v14, %s5276_s9  ;;  %s3988_s9 = sshll.u32 %s5627_s20, 3 }
0x12e1   : > { %v3306_v20 = vpop.xlane.xlu1 %3305 }
0x12e2   : > { %v3307_v21 = vsub.f32 %v3300_v17, %v3306_v20  ;;  %v536_v17 = vld [vmem:[%s6016_s14] sm:$0xf] }
0x12e3   : > { %v3646_v18 = vrot.slane %v536_v17, %v2267_v12  ;;  %v3651_v20 = vrot.slane %v536_v17, %v2272_v16  ;;  %v3812_v43 = vrot.slane %v536_v17, %v2604_v56 }
0x12e4   : > { %v3308_v22 = vmul.f32 1.442695, %v3307_v21 }
0x12e5   : > { %v3394_v28 = vpop.permute.xlu1 %3393 }
0x12e6   : > { %4928 = vpow2.f32 %v3308_v22 }
0x12e9   : > { %v3392_v30 = vpop.permute.xlu1 %3391 }
0x12f0   : > { %v4929_v23 = vpop.eup %4928 }
0x12f1   : > { %v3310_v24 = vsel %vm1566_vm2, %v4929_v23, 0.0 }
0x12f2   : > { %3311 = vadd.xlane.f32.xlu0 %v3310_v24 }
0x1308   : > { %3315 = vrot.lane.b32.xlu0 %v5810_v14, %s5277_s13  ;;  %s6015_s13 = sld [smem:[#allocation25_spill]] }
0x130e   : > { %v4892_v4 = vld [vmem:[%s6015_s13] sm:$0xff]   ;;  %v4893_v5 = vld [vmem:[%s6015_s13 + $0x8] sm:$0xff]   ;;  %v4894_v6 = vld [vmem:[%s6015_s13 + $0x10] sm:$0xff]  }
0x137f   : > { %v3312_v25 = vpop.xlane.xlu0 %3311 }
0x1380   : > { %4930 = vrcp.f32 %v3312_v25 }
0x1383   : > { %v3316_v26 = vpop.permute.xlu0 %3315 }
0x1384   : > { %4433 = vmatpush3.msra.mxu1 %v3316_v26 }
0x1385   : > { %4437 = vmatprep.subr.mxu1 %v5264_v8 }
0x138a   : > { %v4931_v27 = vpop.eup %4930 }
0x138b   : > { %v3314_v29 = vmul.f32 %v4931_v27, %v4929_v23 }
0x138d   : > { %4435 = vmatmul.mubr.msk.f32.vlgmr.msra.gmra.mrb[32].mxu1 %vm1566_vm2, %v3314_v29 }
0x138e   : > { %4438 = vmatpush3.xpose.msk.msra.mxu1 %vm1566_vm2, %v3394_v28  ;;  %4439 = vmatprep.mubr.msk.f32.mxu1 %vm5265_vm0, %v5264_v8 }
0x138f   : > { %4442 = vmatprep.subr.mxu1 %v5264_v8 }
0x1391   : > { %4440 = vmatmul.mubr.msk.f32.vlgmr.msra.gmra.mrb[34].mxu1 %vm1566_vm2, %v3392_v30 }
0x1392   : > { %4444 = vmatprep.mubr.msk.f32.mxu1 %vm5265_vm0, %v5264_v8 }
0x1460   : > { %v3387_v31 = vpop.f32.mrb[32].mxu1 }
0x1461   : > { %v4436_v32 = vpop.f32.mrb[33].mxu1 }
0x1464   : > { %v3465_v33 = vpop.f32.mrb[34].mxu1 }
0x1465   : > { %v4441_v34 = vpop.f32.mrb[35].mxu1  ;;  %v3469_v35 = vsel %vm1566_vm2, %v3465_v33, -inf }
0x1466   : > { %3470 = vmax.xlane.f32.xlu0 %v3469_v35 }
0x147c   : > { %3480 = vrot.lane.b32.xlu0 %v5810_v14, %s5278_s17  ;;  %s4218_s17 = sshll.u32 %s5369_s27, 7  ;;  %s5282_s27 = smov [#allocation16]  }
0x147d   : > { %s5927_s14 = scalar_lea.hbm %s6017_s10, %s4218_s17 }
0x1480   : > { %3561 = vrot.lane.b32.xlu0 %v3387_v31, %s5279_s30  ;;  %s529_s30 = scalar_lea.vmem [#allocation16], %s3988_s9  ;;  %s5170_s9 = sshll.u32 %s5282_s27, 4  ;;  %s5171_s9 = int_to_ptr.vmem [resolvable:$false] %s5170_s9 }
0x1481   : > { %s5172_s0 = scalar_lea.vmem %s5171_s9, 256 }
0x14f3   : > { %v3471_v36 = vpop.xlane.xlu0 %3470 }
0x14f4   : > { %v3472_v15 = vsub.f32 %v3465_v33, %v3471_v36 }
0x14f6   : > { %v3473_v37 = vmul.f32 1.442695, %v3472_v15 }
0x14f7   : > { %v3481_v38 = vpop.permute.xlu0 %3480 }
0x14f8   : > { %4932 = vpow2.f32 %v3473_v37  ;;  %4443 = vmatpush3.msra.mxu1 %v3481_v38 }
0x14f9   : > { %4455 = vmatprep.subr.bf16.mxu1 %v5264_v8 }
0x14fb   : > { %v3562_v48 = vpop.permute.xlu0 %3561 }
0x1502   : > { %v4933_v39 = vpop.eup %4932 }
0x1503   : > { %v3475_v40 = vsel %vm1566_vm2, %v4933_v39, 0.0 }
0x1504   : > { %3476 = vadd.xlane.f32.xlu1 %v3475_v40 }
0x1515   : > { %3557 = vrot.lane.b32.xlu1 %v3222_v9, %s5280_s15  ;;  %s3829_s15 = sshll.u32 %s529_s30, 4  ;;  %s5929_s15 = int_to_ptr.vmem [resolvable:$true] %s3829_s15 }
0x1516   : > { %s5166_s18 = scalar_lea.vmem %s5929_s15, 128  ;;  %p5173_p13 = scmp.lt.s32.totalorder %s5929_s15, %s5171_s9 }
0x1517   : > { %p5167_p10 = scmp.ne.s32.totalorder %s5929_s15, %s5166_s18  ;;  %p5174_p1 = scmp.lt.s32.totalorder %s5172_s0, %s5166_s18 }
0x1519   : > { %p5168_p3 = pnand %p5167_p10, %p6018_p11  ;;  %p5175_p6 = por %p5174_p1, %p5173_p13 }
0x151b   : > { %p5169_p12 = pneg %p5168_p3 }
0x151d   : > { %p5176_p9 = pnand %p5175_p6, %p5169_p12 }
0x1591   : > { %v3477_v41 = vpop.xlane.xlu1 %3476 }
0x1592   : > { %4934 = vrcp.f32 %v3477_v41 }
0x1595   : > { %v3558_v46 = vpop.permute.xlu1 %3557 }
0x1596   : > { %v3568_v47 = vsel %vm1566_vm2, %v5838_v54, %v3558_v46 }
0x1597   : > { %v3570_v50 = vsel %vm3569_vm5, %v3568_v47, %v3562_v48 }
0x159c   : > { %v4935_v42 = vpop.eup %4934 }
0x159d   : > { %v3479_v14 = vmul.f32 %v4935_v42, %v4933_v39  ;;  %v3807_v42 = vrot.slane %v536_v17, %v2599_v55 }
0x159f   : > { %4445 = vmatmul.mubr.msk.f32.vlgmr.msra.gmra.mrb[36].mxu1 %vm1566_vm2, %v3479_v14 }
0x15a0   : > { %4459 = vmatprep.mubr.msk.bf16.mxu1 %vm5265_vm0, %v5264_v8  ;;  %4456 = vmatpush3.bf16.msra.mxu1 %v4890_v3 }
0x15a1   : > { %4457 = vmatprep.subr.bf16.mxu1 %v5264_v8 }
0x1672   : > { %v3552_v45 = vpop.f32.mrb[36].mxu1 }
0x1673   : > { %3565 = vrot.lane.b32.xlu1 %v3552_v45, %s5281_s12  ;;  %v4446_v13 = vpop.f32.mrb[37].mxu1 }
0x16e5   : > { %v3566_v51 = vpop.permute.xlu1 %3565 }
0x16e6   : > { %v3572_v52 = vsel %vm3571_vm6, %v3570_v50, %v3566_v51 }
0x16e7   : > { %v3573_v53 = vpack.c.bf16 %v3572_v52, %v3572_v52 }
0x16e9   : > { %4452 = vmatmul.mubr.msk.bf16.vlgmr.msra.gmra.mrb[24].mxu0 %vm1489_vm1, %v3573_v53 }
0x16ea   : > { %4471 = vmatprep.mubr.msk.bf16.mxu0 %vm5265_vm0, %v5264_v8  ;;  %4464 = vmatpush3.bf16.msra.mxu0 %v4892_v4 }
0x16eb   : > { %4465 = vmatprep.subr.bf16.mxu0 %v5264_v8 }
0x16ee   : > { %4466 = vmatpush3.bf16.msra.mxu0 %v4893_v5 }
0x16ef   : > { %4467 = vmatprep.subr.bf16.mxu0 %v5264_v8 }
0x16f2   : > { %4468 = vmatpush3.bf16.msra.mxu0 %v4894_v6 }
0x16f3   : > { %4469 = vmatprep.subr.bf16.mxu0 %v5264_v8  ;;  %v4895_v8 = vld [vmem:[%s6015_s13 + $0x18] sm:$0xff]  }
0x16f6   : > { %4470 = vmatpush3.bf16.msra.mxu0 %v4895_v8 }
0x17bc   : > { %v3623_v57 = vpop.f32.mrb[24].mxu0 }
0x17bd   : > { %v3624_v58 = vadd.f32 %v3623_v57, %v5826_v49  ;;  %v4453_v59 = vpop.f32.mrb[25].mxu0  ;;  %v4891_v49 = vld [vmem:[%s6014_s28 + $0x8] sm:$0xff]  }
0x17be   : > { %v3626_v60 = vpop.f32.mrb[26].mxu0  ;;  %4458 = vmatpush3.bf16.msra.mxu1 %v4891_v49 }
0x17bf   : > { %v4454_v61 = vpop.f32.mrb[27].mxu0  ;;  %v3629_v54 = vsel %vm1489_vm1, %v3624_v58, 0.0 }
0x17c0   : > { %3630 = vadd.xlane.f32.xlu0 %v3629_v54 }
0x184d   : > { %v3631_v62 = vpop.xlane.xlu0 %3630 }
0x184e   : > { %v3633_v63 = vmul.f32 0.03125, %v3631_v62 }
0x1850   : > { %v3634_v0 = vsub.f32 %v3624_v58, %v3633_v63 }
0x1852   : > { %v3635_v1 = vmul.f32 %v3634_v0, %v3634_v0 }
0x1854   : > { %v3636_v2 = vsel %vm1489_vm1, %v3635_v1, 0.0 }
0x1855   : > { %3637 = vadd.xlane.f32.xlu1 %v3636_v2 }
0x18e2   : > { %v3638_v7 = vpop.xlane.xlu1 %3637 }
0x18e3   : > { %v3639_v9 = vmul.f32 0.03125, %v3638_v7 }
0x18e5   : > { %v3640_v10 = vadd.f32 1e-05, %v3639_v9 }
0x18e7   : > { %4936 = vrsqrt.f32 %v3640_v10 }
0x18f1   : > { %v4937_v19 = vpop.eup %4936 }
0x18f2   : > { %v3642_v21 = vmul.f32 %v4937_v19, %v3634_v0 }
0x18f4   : > { %v3647_v22 = vmul.f32 %v3646_v18, %v3642_v21 }
0x18f6   : > { %v3652_v23 = vadd.f32 %v3651_v20, %v3647_v22 }
0x18f8   : > { %v3665_v24 = vpack.c.bf16 %v3652_v23, %v3652_v23 }
0x18fa   : > { %4460 = vmatmul.mubr.msk.bf16.vlgmr.msra.gmra.mrb[40].mxu1 %vm1489_vm1, %v3665_v24 }
0x19cd   : > { %v3715_v25 = vpop.f32.mrb[40].mxu1 }
0x19ce   : > { %v3721_v26 = vmax.f32 %v3715_v25, 0.0  ;;  %v4461_v27 = vpop.f32.mrb[41].mxu1 }
0x19cf   : > { %v3718_v28 = vpop.f32.mrb[42].mxu1 }
0x19d0   : > { %v3722_v12 = vpack.c.bf16 %v3721_v26, %v3721_v26  ;;  %v4462_v29 = vpop.f32.mrb[43].mxu1 }
0x19d2   : > { %4472 = vmatmul.mubr.msk.bf16.vlgmr.msra.gmra.mrb[28].mxu0 %vm2160_vm3, %v3722_v12 }
0x1aa5   : > { %v3784_v16 = vpop.f32.mrb[28].mxu0 }
0x1aa6   : > { %v3790_v30 = vadd.f32 %v3784_v16, %v3652_v23  ;;  %v4473_v31 = vpop.f32.mrb[29].mxu0 }
0x1aa7   : > { %v3787_v32 = vpop.f32.mrb[30].mxu0 }
0x1aa8   : > { %v4474_v33 = vpop.f32.mrb[31].mxu0  ;;  %v3791_v34 = vsel %vm1489_vm1, %v3790_v30, 0.0 }
0x1aa9   : > { %3792 = vadd.xlane.f32.xlu0 %v3791_v34 }
0x1b36   : > { %v3793_v35 = vpop.xlane.xlu0 %3792 }
0x1b37   : > { %v3794_v36 = vmul.f32 0.03125, %v3793_v35 }
0x1b39   : > { %v3795_v15 = vsub.f32 %v3790_v30, %v3794_v36 }
0x1b3b   : > { %v3796_v37 = vmul.f32 %v3795_v15, %v3795_v15 }
0x1b3d   : > { %v3797_v38 = vsel %vm1489_vm1, %v3796_v37, 0.0 }
0x1b3e   : > { %3798 = vadd.xlane.f32.xlu0 %v3797_v38 }
0x1bcb   : > { %v3799_v39 = vpop.xlane.xlu0 %3798 }
0x1bcc   : > { %v3800_v40 = vmul.f32 0.03125, %v3799_v39 }
0x1bce   : > { %v3801_v41 = vadd.f32 1e-05, %v3800_v40 }
0x1bd0   : > { %4938 = vrsqrt.f32 %v3801_v41 }
0x1bda   : > { %v4939_v14 = vpop.eup %4938 }
0x1bdb   : > { %v3803_v44 = vmul.f32 %v4939_v14, %v3795_v15 }
0x1bdd   : > { %v3808_v45 = vmul.f32 %v3807_v42, %v3803_v44 }
0x1bdf   : > { %v3813_v13 = vadd.f32 %v3812_v43, %v3808_v45 }
0x1be1   : > { %3814 = vst.msk [vmem:[%s529_s30] sm:$0xff] %vm1489_vm1, %v3813_v13 }
0x1be2   : > { %5179 = shalt.err (!%p5176_p9)
}
0x1be3   : > { %s5180_s20 = scalar_lea.hbm %s5927_s14, 128  ;;  %s5184_s12 = scalar_lea.hbm %s6017_s10, 256 }
0x1be4   : > { %p5181_p4 = scmp.ne.s32.totalorder %s5927_s14, %s5180_s20  ;;  %p5185_p5 = scmp.lt.u32.totalorder %s5927_s14, %s6017_s10 }
0x1be5   : > { %p5186_p2 = scmp.lt.u32.totalorder %s5184_s12, %s5180_s20  ;;  %p5188_p10 = scmp.lt.u32.totalorder %s5180_s20, %s5927_s14 }
0x1be6   : > { %p5182_p8 = pnand %p5181_p4, %p6018_p11 }
0x1be7   : > { %p5187_p7 = por %p5186_p2, %p5185_p5 }
0x1be8   : > { %p5183_p0 = pneg %p5182_p8 }
0x1be9   : > { %p5189_p3 = por %p5188_p10, %p5187_p7 }
0x1beb   : > { %p5190_p12 = pnand %p5189_p3, %p5183_p0 }
0x1bed   : > { %5193 = shalt.err (!%p5190_p12)
}
0x1bee   : > { %4513 = dma.vmem_to_hbm [thread:$0]  (%p6018_p11), %s5929_s15, 128, %s5927_s14, %s3816_s26  }
0x1bef PF: > { %s3841_s0 = sand.u32 1, %s5236_s21   ;;  %p6019_p13 = scmp.ne.s32.totalorder %s6002_s19, 0 }
0x1bf0   : > { %p6020_p1 = scmp.ge.s32.totalorder %s5248_s24, 2  ;;  %s3842_s18 = scalar_lea.sflag [#allocation4], %s3841_s0 }
0x1bf2   : > { %p4542_p6 = pnand %p6020_p1, %p6019_p13 }
0x1bf4   : > { %5231 = dma.done.wait (!%p4542_p6), %s3842_s18, 128  }
0x1bf5   : > { %5233 = vsyncadd (!%p4542_p6), %s3842_s18, 4294967168  ;;  %p29_p9 = scmp.ge.s32.totalorder %s5557_s25, 4   ;;  %s6021_s21 = smov %s5240_s22 }
0x1bf6   : > { %s6022_s22 = smov %s5244_s23  ;;  %s6023_s23 = smov %s5569_s29 }
0x1bf7   : > { %s6024_s24 = smov %s5557_s25  ;;  %31 = sbr.rel (!%p29_p9) target bundleno = 15 (0xf), region = 141 }
0x1bfe   :  { %3847 = vsyncpa [#allocation3], 1 }
0x1bff   :  { %3849 = vsyncpa [#allocation3 + $0x1], 1 }
0x1c00   :  { %3850 = vsyncpa [#allocation6], 1 }
0x1c01   :  { %3851 = vsyncpa [#allocation9], 1 }
0x1c02   :  { %3852 = vsyncpa [#allocation12], 1 }
0x1c03   :  { %3853 = vsyncpa [#allocation15], 1 }
0x1c04   :  { %3854 = vsyncpa [#allocation4], 1 }
0x1c05   :  { %3856 = vsyncpa [#allocation4 + $0x1], 1 }

</bundles_post_ra>
